<compile_context>
chip_gen: v7x
topology: tpu7x:2x2x1
jax: 0.10.0
libtpu: 0.0.40
codegen_flags: <defaults>
</compile_context>

<pallas_src>
import functools

import jax
import jax.numpy as jnp
from jax import lax
from jax.experimental import pallas as pl
from jax.experimental.pallas import tpu as pltpu

NEG_MAX = float(-jnp.finfo(jnp.float32).max)   # matches torch max_neg_value(float32)


def _pick_tile(dim_size, target, base):
    """Largest tile <= target that divides dim_size and is a multiple of `base`
    (falls back to the full dimension, which always satisfies the block rule)."""
    if dim_size <= target:
        return dim_size
    t = (target // base) * base
    while t >= base:
        if dim_size % t == 0:
            return t
        t -= base
    return dim_size


# ---------------------------------------------------------------------------
# Tiled matmul kernels (weights pre-transposed once to (K, N) layout so the
# contraction is a plain last x first dot -> no per-tile weight transpose)
# ---------------------------------------------------------------------------
def _matmul_bias_kernel(x_ref, w_ref, b_ref, o_ref, acc_ref):
    @pl.when(pl.program_id(2) == 0)
    def _():
        acc_ref[...] = jnp.zeros_like(acc_ref)

    acc_ref[...] += jnp.dot(x_ref[...], w_ref[...], preferred_element_type=jnp.float32)

    @pl.when(pl.program_id(2) == pl.num_programs(2) - 1)
    def _():
        o_ref[...] = (acc_ref[...] + b_ref[...]).astype(o_ref.dtype)


def _matmul_kernel(x_ref, w_ref, o_ref, acc_ref):
    @pl.when(pl.program_id(2) == 0)
    def _():
        acc_ref[...] = jnp.zeros_like(acc_ref)

    acc_ref[...] += jnp.dot(x_ref[...], w_ref[...], preferred_element_type=jnp.float32)

    @pl.when(pl.program_id(2) == pl.num_programs(2) - 1)
    def _():
        o_ref[...] = acc_ref[...].astype(o_ref.dtype)


def pallas_linear_bias(x, w, bias, *, tm=256, tn=256, tk=512, out_dtype=jnp.bfloat16):
    """y = x @ w + bias ; x:(M,K) bf16, w:(K,N) bf16 (pre-transposed), bias:(N,) f32."""
    M, K = x.shape
    N = w.shape[1]
    tm = _pick_tile(M, tm, 16)     # bf16 sublane packing
    tn = _pick_tile(N, tn, 128)
    tk = _pick_tile(K, tk, 128)
    bias2d = bias.reshape(1, N).astype(jnp.float32)
    return pl.pallas_call(
        _matmul_bias_kernel,
        out_shape=jax.ShapeDtypeStruct((M, N), out_dtype),
        grid=(M // tm, N // tn, K // tk),
        in_specs=[
            pl.BlockSpec((tm, tk), lambda i, j, kk: (i, kk)),
            pl.BlockSpec((tk, tn), lambda i, j, kk: (kk, j)),
            pl.BlockSpec((1, tn), lambda i, j, kk: (0, j)),
        ],
        out_specs=pl.BlockSpec((tm, tn), lambda i, j, kk: (i, j)),
        scratch_shapes=[pltpu.VMEM((tm, tn), jnp.float32)],
        compiler_params=pltpu.CompilerParams(
            dimension_semantics=("parallel", "parallel", "arbitrary")),
    )(x, w, bias2d)


def pallas_linear(x, w, *, tm=256, tn=256, tk=512, out_dtype=jnp.float32):
    """y = x @ w ; x:(M,K) bf16, w:(K,N) bf16 (pre-transposed KN layout), no bias."""
    M, K = x.shape
    N = w.shape[1]
    tm = _pick_tile(M, tm, 16)
    tn = _pick_tile(N, tn, 128)
    tk = _pick_tile(K, tk, 128)
    return pl.pallas_call(
        _matmul_kernel,
        out_shape=jax.ShapeDtypeStruct((M, N), out_dtype),
        grid=(M // tm, N // tn, K // tk),
        in_specs=[
            pl.BlockSpec((tm, tk), lambda i, j, kk: (i, kk)),
            pl.BlockSpec((tk, tn), lambda i, j, kk: (kk, j)),
        ],
        out_specs=pl.BlockSpec((tm, tn), lambda i, j, kk: (i, j)),
        scratch_shapes=[pltpu.VMEM((tm, tn), jnp.float32)],
        compiler_params=pltpu.CompilerParams(
            dimension_semantics=("parallel", "parallel", "arbitrary")),
    )(x, w)


# ---------------------------------------------------------------------------
# Flash attention: online softmax, KV tiled, merged-head lane-dense layout,
# consolidated per-head updates, fused sigmoid output-gate in the finalize.
# ---------------------------------------------------------------------------
def _expand_heads(x, dim_head):
    """(tq, heads) -> (tq, heads*dim_head): replicate each head's value across its lanes."""
    tq, heads = x.shape
    return jnp.concatenate(
        [jnp.broadcast_to(x[:, h:h + 1], (tq, dim_head)) for h in range(heads)], axis=-1)


def _flash_attn_kernel(lens_ref, mask_ref, q_ref, k_ref, v_ref, g_ref, o_ref,
                       m_sc, l_sc, acc_sc, *, heads, dim_head):
    bi = pl.program_id(0)
    ki = pl.program_id(2)
    tkv = k_ref.shape[0]

    @pl.when(ki == 0)
    def _():
        m_sc[...] = jnp.full_like(m_sc, NEG_MAX)
        l_sc[...] = jnp.zeros_like(l_sc)
        acc_sc[...] = jnp.zeros_like(acc_sc)

    # Skip kv tiles lying entirely beyond the last valid key of this batch element
    # (exact for any key mask; saves the exp/MXU cost of padding tiles).
    @pl.when(ki * tkv < lens_ref[bi])
    def _():
        keep = mask_ref[...] != 0                    # (1, tkv), broadcasts over q rows
        m_prev = m_sc[...]                           # (tq, heads) f32
        l_prev = l_sc[...]

        # TODO(synk): for very large `heads` this static unroll should become a
        # fori_loop (vreg pressure); for typical heads (4-8) unroll + consolidation wins.
        m_cols, psum_cols, pv_cols = [], [], []
        for h in range(heads):
            lo = h * dim_head
            q_h = q_ref[:, lo:lo + dim_head]         # (tq,  d) bf16 (scale folded into Wq)
            k_h = k_ref[:, lo:lo + dim_head]         # (tkv, d) bf16
            v_h = v_ref[:, lo:lo + dim_head]         # (tkv, d) bf16

            s = lax.dot_general(                     # q @ k^T -> (tq, tkv) f32
                q_h, k_h, dimension_numbers=(((1,), (1,)), ((), ())),
                preferred_element_type=jnp.float32)
            s = jnp.where(keep, s, NEG_MAX)

            m_h = jnp.maximum(m_prev[:, h:h + 1], jnp.max(s, axis=-1, keepdims=True))
            p = jnp.exp(s - m_h)                     # (tq, tkv)
            m_cols.append(m_h)
            psum_cols.append(jnp.sum(p, axis=-1, keepdims=True))
            pv_cols.append(jnp.dot(p.astype(jnp.bfloat16), v_h,
                                   preferred_element_type=jnp.float32))

        # One full-width store each (no per-head masked sub-lane read-modify-writes).
        m_new = jnp.concatenate(m_cols, axis=-1)                       # (tq, heads)
        alpha = jnp.exp(m_prev - m_new)                                # (tq, heads)
        m_sc[...] = m_new
        l_sc[...] = alpha * l_prev + jnp.concatenate(psum_cols, axis=-1)
        alpha_b = _expand_heads(alpha, dim_head)                       # (tq, dim_inner)
        acc_sc[...] = alpha_b * acc_sc[...] + jnp.concatenate(pv_cols, axis=-1)

    @pl.when(ki == pl.num_programs(2) - 1)
    def _():
        # single normalize + fused sigmoid gate + single lane-dense store
        inv_l = pl.reciprocal(l_sc[...], approx=True)   # (tq, heads); approx=False ~free too
        inv_b = _expand_heads(inv_l, dim_head)          # (tq, dim_inner)
        gate = jax.nn.sigmoid(g_ref[...].astype(jnp.float32))
        o_ref[...] = (acc_sc[...] * inv_b * gate).astype(o_ref.dtype)


def pallas_flash_attention(proj, mask, *, heads, dim_head, tq=512, tkv=256):
    """proj: (b, n, 4*dim_inner) bf16 holding [q*scale | k | v | gates] along the last dim;
    mask: (b, n) bool key mask. Returns gated attention output (b, n, dim_inner) bf16
    in merged-head layout."""
    b, n, four_di = proj.shape
    dim_inner = heads * dim_head
    assert four_di == 4 * dim_inner

    tq = _pick_tile(n, tq, 16)      # bf16 sublane base
    tkv = _pick_tile(n, tkv, 128)   # also the lane dim of the streamed mask block

    mask_i = mask.astype(jnp.int32).reshape(b, 1, n)
    # last valid key + 1, per batch (scalar-prefetched; lets the kernel skip padded tiles).
    # Degenerate all-masked rows (kv_last == 0) would yield inf/nan instead of the torch
    # "uniform over masked keys" behaviour — not hit for real key-padding masks.
    kv_last = jnp.max(
        jnp.where(mask, jnp.arange(n, dtype=jnp.int32)[None, :] + 1, 0), axis=-1
    ).astype(jnp.int32)

    if dim_inner % 128 == 0:
        # lane-aligned: address q/k/v/gates as block-columns 0..3 of proj directly
        # (no wrapper slices => no extra HBM round trips)
        srcs = (proj, proj, proj, proj)
        cols = (0, 1, 2, 3)
    else:
        # TODO(synk): lane-unaligned dim_inner falls back to XLA slices (extra HBM copies)
        srcs = tuple(lax.slice_in_dim(proj, c * dim_inner, (c + 1) * dim_inner, axis=2)
                     for c in range(4))
        cols = (0, 0, 0, 0)

    in_specs = [
        pl.BlockSpec((None, 1, tkv), lambda bi, qi, ki, lens: (bi, 0, ki)),       # mask
        pl.BlockSpec((None, tq, dim_inner),
                     lambda bi, qi, ki, lens, c=cols[0]: (bi, qi, c)),            # q
        pl.BlockSpec((None, tkv, dim_inner),
                     lambda bi, qi, ki, lens, c=cols[1]: (bi, ki, c)),            # k
        pl.BlockSpec((None, tkv, dim_inner),
                     lambda bi, qi, ki, lens, c=cols[2]: (bi, ki, c)),            # v
        pl.BlockSpec((None, tq, dim_inner),
                     lambda bi, qi, ki, lens, c=cols[3]: (bi, qi, c)),            # gates
    ]

    kernel = functools.partial(_flash_attn_kernel, heads=heads, dim_head=dim_head)
    return pl.pallas_call(
        kernel,
        out_shape=jax.ShapeDtypeStruct((b, n, dim_inner), jnp.bfloat16),
        grid_spec=pltpu.PrefetchScalarGridSpec(
            num_scalar_prefetch=1,
            grid=(b, n // tq, n // tkv),
            in_specs=in_specs,
            out_specs=pl.BlockSpec((None, tq, dim_inner),
                                   lambda bi, qi, ki, lens: (bi, qi, 0)),
            scratch_shapes=[
                pltpu.VMEM((tq, heads), jnp.float32),      # running max (per head)
                pltpu.VMEM((tq, heads), jnp.float32),      # running denom (per head)
                pltpu.VMEM((tq, dim_inner), jnp.float32),  # un-normalized output
            ]),
        compiler_params=pltpu.CompilerParams(
            dimension_semantics=("parallel", "parallel", "arbitrary")),
    )(kv_last, mask_i, *srcs)


# ---------------------------------------------------------------------------
# Module: parameters, one-time prepack, forward
# ---------------------------------------------------------------------------
def init_attention_params(key, dim, dim_head, heads):
    dim_inner = dim_head * heads
    k1, k2, k3, k4 = jax.random.split(key, 4)
    return {
        # torch nn.Linear layout: weight is (out_features, in_features)
        "wq": jax.random.normal(k1, (dim_inner, dim), jnp.float32) / jnp.sqrt(dim),
        "bq": 0.1 * jax.random.normal(k2, (dim_inner,), jnp.float32),
        "wkv": jax.random.normal(k3, (2 * dim_inner, dim), jnp.float32) / jnp.sqrt(dim),
        "wo": jax.random.normal(k4, (dim, dim_inner), jnp.float32) / jnp.sqrt(dim_inner),
        # gate_output=True: nn.init.zeros_(weight), nn.init.constant_(bias, 1.0)
        "wg": jnp.zeros((dim_inner, dim), jnp.float32),
        "bg": jnp.ones((dim_inner,), jnp.float32),
    }


def prepack_attention_params(params, *, dim_head, scale=None):
    """One-time packing (hoisted out of forward): fold the softmax scale into Wq/bq in
    f32, concat [Wq; Wkv; Wg], pre-transpose all weights to (K, N) layout, cast bf16."""
    dim_inner = params["wq"].shape[0]
    if scale is None:
        scale = dim_head ** -0.5
    wq = params["wq"] * scale
    bq = params["bq"] * scale
    w_cat = jnp.concatenate([wq, params["wkv"], params["wg"]], axis=0)   # (4*di, dim)
    b_cat = jnp.concatenate([bq, jnp.zeros((2 * dim_inner,), jnp.float32), params["bg"]])
    return {
        "w_proj": jnp.asarray(w_cat.T, jnp.bfloat16),      # (dim, 4*dim_inner)
        "b_proj": jnp.asarray(b_cat, jnp.float32),         # (4*dim_inner,)
        "w_out": jnp.asarray(params["wo"].T, jnp.bfloat16),  # (dim_inner, dim)
    }


def attention_forward(packed, seq, mask=None, *, heads, dim_head):
    # TODO(synk): attn_bias is silently dropped by the PyTorch flash path (can_use_flash
    # is a non-empty tuple => always truthy); `context` (cross-attention), window_size
    # (local attention) and attention dropout are not plumbed here.
    b, n, dim = seq.shape
    dim_inner = heads * dim_head

    x2d = seq.reshape(b * n, dim).astype(jnp.bfloat16)

    # fused projection: [q*scale | k | v | gates] = x @ [Wq*s; Wkv; Wg]^T + [bq*s; 0; bg]
    proj = pallas_linear_bias(x2d, packed["w_proj"], packed["b_proj"])   # (b*n, 4*di) bf16

    if mask is None:
        mask = jnp.ones((b, n), dtype=bool)

    # flash attention with the sigmoid output-gate fused into its finalize
    attn_gated = pallas_flash_attention(proj.reshape(b, n, 4 * dim_inner), mask,
                                        heads=heads, dim_head=dim_head)

    # plain bias-free output projection
    out = pallas_linear(attn_gated.reshape(b * n, dim_inner), packed["w_out"])
    return out.reshape(b, n, dim)


# ---------------------------------------------------------------------------
# Pure-JAX f32 reference (for correctness check)
# ---------------------------------------------------------------------------
def attention_ref(params, seq, mask, *, heads, dim_head):
    b, n, dim = seq.shape
    q = seq @ params["wq"].T + params["bq"]
    kv = seq @ params["wkv"].T
    k, v = jnp.split(kv, 2, axis=-1)

    def sh(t):
        return t.reshape(b, n, heads, dim_head).transpose(0, 2, 1, 3)

    q, k, v = (sh(t) for t in (q, k, v))
    scale = dim_head ** -0.5
    sim = jnp.einsum("bhid,bhjd->bhij", q * scale, k)
    sim = jnp.where(mask[:, None, None, :], sim, NEG_MAX)
    attn = jax.nn.softmax(sim, axis=-1)
    o = jnp.einsum("bhij,bhjd->bhid", attn, v)
    o = o.transpose(0, 2, 1, 3).reshape(b, n, heads * dim_head)
    gates = seq @ params["wg"].T + params["bg"]
    o = o * jax.nn.sigmoid(gates)
    return o @ params["wo"].T


# ---------------------------------------------------------------------------
if __name__ == "__main__":
    batch, seq_len, dim = 2, 16, 64
    heads, dim_head = 4, 32          # dim_inner = 128 (lane-aligned column BlockSpecs path)

    key = jax.random.PRNGKey(0)
    kp, kx = jax.random.split(key)
    params = init_attention_params(kp, dim, dim_head, heads)
    packed = prepack_attention_params(params, dim_head=dim_head)   # hoisted one-time prepack
    seq = jax.random.normal(kx, (batch, seq_len, dim), jnp.float32)

    # key-padding mask: first batch fully valid, second batch has 11 valid tokens
    lens = jnp.array([seq_len, 11])
    mask = jnp.arange(seq_len)[None, :] < lens[:, None]            # (b, n) bool

    fwd = jax.jit(functools.partial(attention_forward, heads=heads, dim_head=dim_head))
    out = jax.block_until_ready(fwd(packed, seq, mask))

    ref = attention_ref(params, seq, mask, heads=heads, dim_head=dim_head)
    assert out.shape == (batch, seq_len, dim)
    # bf16 MXU matmuls + approx reciprocal => loose (but meaningful) tolerance
    max_err = float(jnp.max(jnp.abs(out.astype(jnp.float32) - ref)))
    ref_scale = float(jnp.max(jnp.abs(ref)))
    assert max_err <= 0.05 * ref_scale + 0.05, (
        f"mismatch vs JAX reference: max_err={max_err}, ref_scale={ref_scale}")

    print("KERNEL_OK")
</pallas_src>

<mosaic_0001>
module attributes {stable_mosaic.version = 11 : i64} {
  func.func @_matmul_bias_kernel(%arg0: i32, %arg1: i32, %arg2: i32, %arg3: memref<32x64xbf16, #tpu.memory_space<vmem>>, %arg4: memref<64x256xbf16, #tpu.memory_space<vmem>>, %arg5: memref<1x256xf32, #tpu.memory_space<vmem>>, %arg6: memref<32x256xbf16, #tpu.memory_space<vmem>>, %arg7: memref<32x256xf32, #tpu.memory_space<vmem>>) attributes {dimension_semantics = [#tpu.dimension_semantics<parallel>, #tpu.dimension_semantics<parallel>, #tpu.dimension_semantics<arbitrary>], iteration_bounds = array<i64: 1, 2, 1>, scalar_prefetch = 0 : i64, scratch_operands = 1 : i64, tpu.core_type = #tpu.core_type<tc>, window_params = [{transform_indices = @transform_0, window_bounds = array<i64: 32, 64>}, {transform_indices = @transform_1, window_bounds = array<i64: 64, 256>}, {transform_indices = @transform_2, window_bounds = array<i64: 1, 256>}, {transform_indices = @transform_3, window_bounds = array<i64: 32, 256>}]} {
    %c0_i32 = arith.constant 0 : i32
    %0 = arith.cmpi eq, %arg2, %c0_i32 : i32
    %1 = arith.extui %0 : i1 to i32
    %c0_i32_0 = arith.constant 0 : i32
    %2 = arith.cmpi ne, %1, %c0_i32_0 : i32
    scf.if %2 {
      %cst_10 = arith.constant 0.000000e+00 : f32
      %12 = vector.broadcast %cst_10 : f32 to vector<32x256xf32>
      %c0_11 = arith.constant 0 : index
      %c0_12 = arith.constant 0 : index
      %13 = vector.load %arg7[%c0_11, %c0_12] : memref<32x256xf32, #tpu.memory_space<vmem>>, vector<32x256xf32>
      tpu.vector_store %arg7[%c0_11, %c0_12], %12 {strides = array<i32>} : memref<32x256xf32, #tpu.memory_space<vmem>>, vector<32x256xf32>,
    } else {
    }
    %c0 = arith.constant 0 : index
    %c0_1 = arith.constant 0 : index
    %3 = vector.load %arg7[%c0, %c0_1] : memref<32x256xf32, #tpu.memory_space<vmem>>, vector<32x256xf32>
    %c0_2 = arith.constant 0 : index
    %c0_3 = arith.constant 0 : index
    %4 = vector.load %arg3[%c0_2, %c0_3] : memref<32x64xbf16, #tpu.memory_space<vmem>>, vector<32x64xbf16>
    %c0_4 = arith.constant 0 : index
    %c0_5 = arith.constant 0 : index
    %5 = vector.load %arg4[%c0_4, %c0_5] : memref<64x256xbf16, #tpu.memory_space<vmem>>, vector<64x256xbf16>
    %cst = arith.constant dense<0.000000e+00> : vector<32x256xf32>
    %6 = tpu.matmul %4, %5, %cst {dimension_numbers = #tpu.dot_dimension_numbers<[1], [0], [0], [1], [0, 0, 1, 1], [], []>} : vector<32x64xbf16>, vector<64x256xbf16>, vector<32x256xf32> -> vector<32x256xf32>
    %7 = arith.addf %3, %6 : vector<32x256xf32>
    %c0_6 = arith.constant 0 : index
    %c0_7 = arith.constant 0 : index
    %8 = vector.load %arg7[%c0_6, %c0_7] : memref<32x256xf32, #tpu.memory_space<vmem>>, vector<32x256xf32>
    tpu.vector_store %arg7[%c0_6, %c0_7], %7 {strides = array<i32>} : memref<32x256xf32, #tpu.memory_space<vmem>>, vector<32x256xf32>,
    %c0_i32_8 = arith.constant 0 : i32
    %9 = arith.cmpi eq, %arg2, %c0_i32_8 : i32
    %10 = arith.extui %9 : i1 to i32
    %c0_i32_9 = arith.constant 0 : i32
    %11 = arith.cmpi ne, %10, %c0_i32_9 : i32
    scf.if %11 {
      %c0_10 = arith.constant 0 : index
      %c0_11 = arith.constant 0 : index
      %12 = vector.load %arg7[%c0_10, %c0_11] : memref<32x256xf32, #tpu.memory_space<vmem>>, vector<32x256xf32>
      %c0_12 = arith.constant 0 : index
      %c0_13 = arith.constant 0 : index
      %13 = vector.load %arg5[%c0_12, %c0_13] : memref<1x256xf32, #tpu.memory_space<vmem>>, vector<1x256xf32>
      %14 = vector.broadcast %13 : vector<1x256xf32> to vector<32x256xf32>
      %15 = arith.addf %12, %14 : vector<32x256xf32>
      %16 = arith.truncf %15 : vector<32x256xf32> to vector<32x256xbf16>
      %c0_14 = arith.constant 0 : index
      %c0_15 = arith.constant 0 : index
      %17 = vector.load %arg6[%c0_14, %c0_15] : memref<32x256xbf16, #tpu.memory_space<vmem>>, vector<32x256xbf16>
      tpu.vector_store %arg6[%c0_14, %c0_15], %16 {strides = array<i32>} : memref<32x256xbf16, #tpu.memory_space<vmem>>, vector<32x256xbf16>,
    } else {
    }
    return
  }
  func.func @transform_0(%arg0: i32, %arg1: i32, %arg2: i32) -> (i32, i32) {
    %c0_i32 = arith.constant 0 : i32
    return %arg0, %arg2 : i32, i32
  }
  func.func @transform_1(%arg0: i32, %arg1: i32, %arg2: i32) -> (i32, i32) {
    %c0_i32 = arith.constant 0 : i32
    return %arg2, %arg1 : i32, i32
  }
  func.func @transform_2(%arg0: i32, %arg1: i32, %arg2: i32) -> (i32, i32) {
    %c0_i32 = arith.constant 0 : i32
    %c0_i32_0 = arith.constant 0 : i32
    return %c0_i32, %arg1 : i32, i32
  }
  func.func @transform_3(%arg0: i32, %arg1: i32, %arg2: i32) -> (i32, i32) {
    %c0_i32 = arith.constant 0 : i32
    return %arg0, %arg1 : i32, i32
  }
}

module attributes {stable_mosaic.version = 11 : i64} {
  func.func @_matmul_kernel(%arg0: i32, %arg1: i32, %arg2: i32, %arg3: memref<32x128xbf16, #tpu.memory_space<vmem>>, %arg4: memref<128x64xbf16, #tpu.memory_space<vmem>>, %arg5: memref<32x64xf32, #tpu.memory_space<vmem>>, %arg6: memref<32x64xf32, #tpu.memory_space<vmem>>) attributes {dimension_semantics = [#tpu.dimension_semantics<parallel>, #tpu.dimension_semantics<parallel>, #tpu.dimension_semantics<arbitrary>], iteration_bounds = array<i64: 1, 1, 1>, scalar_prefetch = 0 : i64, scratch_operands = 1 : i64, tpu.core_type = #tpu.core_type<tc>, window_params = [{transform_indices = @transform_0, window_bounds = array<i64: 32, 128>}, {transform_indices = @transform_1, window_bounds = array<i64: 128, 64>}, {transform_indices = @transform_2, window_bounds = array<i64: 32, 64>}]} {
    %c0_i32 = arith.constant 0 : i32
    %0 = arith.cmpi eq, %arg2, %c0_i32 : i32
    %1 = arith.extui %0 : i1 to i32
    %c0_i32_0 = arith.constant 0 : i32
    %2 = arith.cmpi ne, %1, %c0_i32_0 : i32
    scf.if %2 {
      %cst_10 = arith.constant 0.000000e+00 : f32
      %12 = vector.broadcast %cst_10 : f32 to vector<32x64xf32>
      %c0_11 = arith.constant 0 : index
      %c0_12 = arith.constant 0 : index
      %13 = vector.load %arg6[%c0_11, %c0_12] : memref<32x64xf32, #tpu.memory_space<vmem>>, vector<32x64xf32>
      tpu.vector_store %arg6[%c0_11, %c0_12], %12 {strides = array<i32>} : memref<32x64xf32, #tpu.memory_space<vmem>>, vector<32x64xf32>,
    } else {
    }
    %c0 = arith.constant 0 : index
    %c0_1 = arith.constant 0 : index
    %3 = vector.load %arg6[%c0, %c0_1] : memref<32x64xf32, #tpu.memory_space<vmem>>, vector<32x64xf32>
    %c0_2 = arith.constant 0 : index
    %c0_3 = arith.constant 0 : index
    %4 = vector.load %arg3[%c0_2, %c0_3] : memref<32x128xbf16, #tpu.memory_space<vmem>>, vector<32x128xbf16>
    %c0_4 = arith.constant 0 : index
    %c0_5 = arith.constant 0 : index
    %5 = vector.load %arg4[%c0_4, %c0_5] : memref<128x64xbf16, #tpu.memory_space<vmem>>, vector<128x64xbf16>
    %cst = arith.constant dense<0.000000e+00> : vector<32x64xf32>
    %6 = tpu.matmul %4, %5, %cst {dimension_numbers = #tpu.dot_dimension_numbers<[1], [0], [0], [1], [0, 0, 1, 1], [], []>} : vector<32x128xbf16>, vector<128x64xbf16>, vector<32x64xf32> -> vector<32x64xf32>
    %7 = arith.addf %3, %6 : vector<32x64xf32>
    %c0_6 = arith.constant 0 : index
    %c0_7 = arith.constant 0 : index
    %8 = vector.load %arg6[%c0_6, %c0_7] : memref<32x64xf32, #tpu.memory_space<vmem>>, vector<32x64xf32>
    tpu.vector_store %arg6[%c0_6, %c0_7], %7 {strides = array<i32>} : memref<32x64xf32, #tpu.memory_space<vmem>>, vector<32x64xf32>,
    %c0_i32_8 = arith.constant 0 : i32
    %9 = arith.cmpi eq, %arg2, %c0_i32_8 : i32
    %10 = arith.extui %9 : i1 to i32
    %c0_i32_9 = arith.constant 0 : i32
    %11 = arith.cmpi ne, %10, %c0_i32_9 : i32
    scf.if %11 {
      %c0_10 = arith.constant 0 : index
      %c0_11 = arith.constant 0 : index
      %12 = vector.load %arg6[%c0_10, %c0_11] : memref<32x64xf32, #tpu.memory_space<vmem>>, vector<32x64xf32>
      %c0_12 = arith.constant 0 : index
      %c0_13 = arith.constant 0 : index
      %13 = vector.load %arg5[%c0_12, %c0_13] : memref<32x64xf32, #tpu.memory_space<vmem>>, vector<32x64xf32>
      tpu.vector_store %arg5[%c0_12, %c0_13], %12 {strides = array<i32>} : memref<32x64xf32, #tpu.memory_space<vmem>>, vector<32x64xf32>,
    } else {
    }
    return
  }
  func.func @transform_0(%arg0: i32, %arg1: i32, %arg2: i32) -> (i32, i32) {
    %c0_i32 = arith.constant 0 : i32
    return %arg0, %arg2 : i32, i32
  }
  func.func @transform_1(%arg0: i32, %arg1: i32, %arg2: i32) -> (i32, i32) {
    %c0_i32 = arith.constant 0 : i32
    return %arg2, %arg1 : i32, i32
  }
  func.func @transform_2(%arg0: i32, %arg1: i32, %arg2: i32) -> (i32, i32) {
    %c0_i32 = arith.constant 0 : i32
    return %arg0, %arg1 : i32, i32
  }
}

module attributes {stable_mosaic.version = 11 : i64} {
  func.func @_flash_attn_kernel(%arg0: i32, %arg1: i32, %arg2: i32, %arg3: memref<2xi32, #tpu.memory_space<smem>>, %arg4: memref<1x1x16xi32, #tpu.memory_space<vmem>>, %arg5: memref<1x16x128xbf16, #tpu.memory_space<vmem>>, %arg6: memref<1x16x128xbf16, #tpu.memory_space<vmem>>, %arg7: memref<1x16x128xbf16, #tpu.memory_space<vmem>>, %arg8: memref<1x16x128xbf16, #tpu.memory_space<vmem>>, %arg9: memref<1x16x128xbf16, #tpu.memory_space<vmem>>, %arg10: memref<16x4xf32, #tpu.memory_space<vmem>>, %arg11: memref<16x4xf32, #tpu.memory_space<vmem>>, %arg12: memref<16x128xf32, #tpu.memory_space<vmem>>) attributes {dimension_semantics = [#tpu.dimension_semantics<parallel>, #tpu.dimension_semantics<parallel>, #tpu.dimension_semantics<arbitrary>], iteration_bounds = array<i64: 2, 1, 1>, scalar_prefetch = 1 : i64, scratch_operands = 3 : i64, tpu.core_type = #tpu.core_type<tc>, window_params = [{transform_indices = @transform_0, window_bounds = array<i64: 1, 1, 16>}, {transform_indices = @transform_1, window_bounds = array<i64: 1, 16, 128>}, {transform_indices = @transform_2, window_bounds = array<i64: 1, 16, 128>}, {transform_indices = @transform_3, window_bounds = array<i64: 1, 16, 128>}, {transform_indices = @transform_4, window_bounds = array<i64: 1, 16, 128>}, {transform_indices = @transform_5, window_bounds = array<i64: 1, 16, 128>}]} {
    %c0_i32 = arith.constant 0 : i32
    %0 = arith.cmpi eq, %arg2, %c0_i32 : i32
    %1 = arith.extui %0 : i1 to i32
    %c0_i32_0 = arith.constant 0 : i32
    %2 = arith.cmpi ne, %1, %c0_i32_0 : i32
    scf.if %2 {
      %cst = arith.constant -3.40282347E+38 : f32
      %12 = vector.broadcast %cst : f32 to vector<16x4xf32>
      %c0 = arith.constant 0 : index
      %c0_4 = arith.constant 0 : index
      %13 = vector.load %arg10[%c0, %c0_4] : memref<16x4xf32, #tpu.memory_space<vmem>>, vector<16x4xf32>
      tpu.vector_store %arg10[%c0, %c0_4], %12 {strides = array<i32>} : memref<16x4xf32, #tpu.memory_space<vmem>>, vector<16x4xf32>,
      %cst_5 = arith.constant 0.000000e+00 : f32
      %14 = vector.broadcast %cst_5 : f32 to vector<16x4xf32>
      %c0_6 = arith.constant 0 : index
      %c0_7 = arith.constant 0 : index
      %15 = vector.load %arg11[%c0_6, %c0_7] : memref<16x4xf32, #tpu.memory_space<vmem>>, vector<16x4xf32>
      tpu.vector_store %arg11[%c0_6, %c0_7], %14 {strides = array<i32>} : memref<16x4xf32, #tpu.memory_space<vmem>>, vector<16x4xf32>,
      %cst_8 = arith.constant 0.000000e+00 : f32
      %16 = vector.broadcast %cst_8 : f32 to vector<16x128xf32>
      %c0_9 = arith.constant 0 : index
      %c0_10 = arith.constant 0 : index
      %17 = vector.load %arg12[%c0_9, %c0_10] : memref<16x128xf32, #tpu.memory_space<vmem>>, vector<16x128xf32>
      tpu.vector_store %arg12[%c0_9, %c0_10], %16 {strides = array<i32>} : memref<16x128xf32, #tpu.memory_space<vmem>>, vector<16x128xf32>,
    } else {
    }
    %c16_i32 = arith.constant 16 : i32
    %3 = arith.muli %arg2, %c16_i32 : i32
    %4 = arith.index_cast %arg0 : i32 to index
    %5 = memref.load %arg3[%4] : memref<2xi32, #tpu.memory_space<smem>>
    %6 = arith.cmpi slt, %3, %5 : i32
    %7 = arith.extui %6 : i1 to i32
    %c0_i32_1 = arith.constant 0 : i32
    %8 = arith.cmpi ne, %7, %c0_i32_1 : i32
    scf.if %8 {
      %c0 = arith.constant 0 : index
      %c0_4 = arith.constant 0 : index
      %c0_5 = arith.constant 0 : index
      %12 = vector.load %arg4[%c0, %c0_4, %c0_5] : memref<1x1x16xi32, #tpu.memory_space<vmem>>, vector<1x1x16xi32>
      %13 = vector.shape_cast %12 : vector<1x1x16xi32> to vector<1x16xi32>
      %c0_i32_6 = arith.constant 0 : i32
      %14 = vector.broadcast %c0_i32_6 : i32 to vector<1x16xi32>
      %15 = arith.cmpi ne, %13, %14 : vector<1x16xi32>
      %c0_7 = arith.constant 0 : index
      %c0_8 = arith.constant 0 : index
      %16 = vector.load %arg10[%c0_7, %c0_8] : memref<16x4xf32, #tpu.memory_space<vmem>>, vector<16x4xf32>
      %c0_9 = arith.constant 0 : index
      %c0_10 = arith.constant 0 : index
      %17 = vector.load %arg11[%c0_9, %c0_10] : memref<16x4xf32, #tpu.memory_space<vmem>>, vector<16x4xf32>
      %c0_11 = arith.constant 0 : index
      %c0_12 = arith.constant 0 : index
      %c0_13 = arith.constant 0 : index
      %18 = vector.load %arg5[%c0_11, %c0_12, %c0_13] : memref<1x16x128xbf16, #tpu.memory_space<vmem>>, vector<1x16x32xbf16>
      %19 = vector.shape_cast %18 : vector<1x16x32xbf16> to vector<16x32xbf16>
      %c0_14 = arith.constant 0 : index
      %c0_15 = arith.constant 0 : index
      %c0_16 = arith.constant 0 : index
      %20 = vector.load %arg6[%c0_14, %c0_15, %c0_16] : memref<1x16x128xbf16, #tpu.memory_space<vmem>>, vector<1x16x32xbf16>
      %21 = vector.shape_cast %20 : vector<1x16x32xbf16> to vector<16x32xbf16>
      %c0_17 = arith.constant 0 : index
      %c0_18 = arith.constant 0 : index
      %c0_19 = arith.constant 0 : index
      %22 = vector.load %arg7[%c0_17, %c0_18, %c0_19] : memref<1x16x128xbf16, #tpu.memory_space<vmem>>, vector<1x16x32xbf16>
      %23 = vector.shape_cast %22 : vector<1x16x32xbf16> to vector<16x32xbf16>
      %cst = arith.constant dense<0.000000e+00> : vector<16x16xf32>
      %24 = tpu.matmul %19, %21, %cst {dimension_numbers = #tpu.dot_dimension_numbers<[1], [1], [0], [0], [0, 0, 1, 0], [], []>} : vector<16x32xbf16>, vector<16x32xbf16>, vector<16x16xf32> -> vector<16x16xf32>
      %cst_20 = arith.constant -3.40282347E+38 : f32
      %25 = vector.shape_cast %15 : vector<1x16xi1> to vector<1x16xi1>
      %26 = vector.broadcast %25 : vector<1x16xi1> to vector<16x16xi1>
      %27 = vector.broadcast %cst_20 : f32 to vector<16x16xf32>
      %28 = arith.select %26, %24, %27 : vector<16x16xi1>, vector<16x16xf32>
      %29 = vector.extract_strided_slice %16 {offsets = [0, 0], sizes = [16, 1], strides = [1, 1]} : vector<16x4xf32> to vector<16x1xf32>
      %cst_21 = arith.constant dense<0xFF800000> : vector<16xf32>
      %30 = vector.multi_reduction <maximumf>, %28, %cst_21 [1] : vector<16x16xf32> to vector<16xf32>
      %31 = vector.shape_cast %30 : vector<16xf32> to vector<16x1xf32>
      %32 = arith.maximumf %29, %31 : vector<16x1xf32>
      %33 = vector.broadcast %32 : vector<16x1xf32> to vector<16x16xf32>
      %34 = arith.subf %28, %33 : vector<16x16xf32>
      %35 = math.exp %34 : vector<16x16xf32>
      %cst_22 = arith.constant dense<0.000000e+00> : vector<16xf32>
      %36 = vector.multi_reduction <add>, %35, %cst_22 [1] : vector<16x16xf32> to vector<16xf32>
      %37 = vector.shape_cast %36 : vector<16xf32> to vector<16x1xf32>
      %38 = arith.truncf %35 : vector<16x16xf32> to vector<16x16xbf16>
      %cst_23 = arith.constant dense<0.000000e+00> : vector<16x32xf32>
      %39 = tpu.matmul %38, %23, %cst_23 {dimension_numbers = #tpu.dot_dimension_numbers<[1], [0], [0], [1], [0, 0, 1, 1], [], []>} : vector<16x16xbf16>, vector<16x32xbf16>, vector<16x32xf32> -> vector<16x32xf32>
      %c0_24 = arith.constant 0 : index
      %c0_25 = arith.constant 0 : index
      %c32 = arith.constant 32 : index
      %40 = vector.load %arg5[%c0_24, %c0_25, %c32] : memref<1x16x128xbf16, #tpu.memory_space<vmem>>, vector<1x16x32xbf16>
      %41 = vector.shape_cast %40 : vector<1x16x32xbf16> to vector<16x32xbf16>
      %c0_26 = arith.constant 0 : index
      %c0_27 = arith.constant 0 : index
      %c32_28 = arith.constant 32 : index
      %42 = vector.load %arg6[%c0_26, %c0_27, %c32_28] : memref<1x16x128xbf16, #tpu.memory_space<vmem>>, vector<1x16x32xbf16>
      %43 = vector.shape_cast %42 : vector<1x16x32xbf16> to vector<16x32xbf16>
      %c0_29 = arith.constant 0 : index
      %c0_30 = arith.constant 0 : index
      %c32_31 = arith.constant 32 : index
      %44 = vector.load %arg7[%c0_29, %c0_30, %c32_31] : memref<1x16x128xbf16, #tpu.memory_space<vmem>>, vector<1x16x32xbf16>
      %45 = vector.shape_cast %44 : vector<1x16x32xbf16> to vector<16x32xbf16>
      %cst_32 = arith.constant dense<0.000000e+00> : vector<16x16xf32>
      %46 = tpu.matmul %41, %43, %cst_32 {dimension_numbers = #tpu.dot_dimension_numbers<[1], [1], [0], [0], [0, 0, 1, 0], [], []>} : vector<16x32xbf16>, vector<16x32xbf16>, vector<16x16xf32> -> vector<16x16xf32>
      %cst_33 = arith.constant -3.40282347E+38 : f32
      %47 = vector.shape_cast %15 : vector<1x16xi1> to vector<1x16xi1>
      %48 = vector.broadcast %47 : vector<1x16xi1> to vector<16x16xi1>
      %49 = vector.broadcast %cst_33 : f32 to vector<16x16xf32>
      %50 = arith.select %48, %46, %49 : vector<16x16xi1>, vector<16x16xf32>
      %51 = vector.extract_strided_slice %16 {offsets = [0, 1], sizes = [16, 1], strides = [1, 1]} : vector<16x4xf32> to vector<16x1xf32>
      %cst_34 = arith.constant dense<0xFF800000> : vector<16xf32>
      %52 = vector.multi_reduction <maximumf>, %50, %cst_34 [1] : vector<16x16xf32> to vector<16xf32>
      %53 = vector.shape_cast %52 : vector<16xf32> to vector<16x1xf32>
      %54 = arith.maximumf %51, %53 : vector<16x1xf32>
      %55 = vector.broadcast %54 : vector<16x1xf32> to vector<16x16xf32>
      %56 = arith.subf %50, %55 : vector<16x16xf32>
      %57 = math.exp %56 : vector<16x16xf32>
      %cst_35 = arith.constant dense<0.000000e+00> : vector<16xf32>
      %58 = vector.multi_reduction <add>, %57, %cst_35 [1] : vector<16x16xf32> to vector<16xf32>
      %59 = vector.shape_cast %58 : vector<16xf32> to vector<16x1xf32>
      %60 = arith.truncf %57 : vector<16x16xf32> to vector<16x16xbf16>
      %cst_36 = arith.constant dense<0.000000e+00> : vector<16x32xf32>
      %61 = tpu.matmul %60, %45, %cst_36 {dimension_numbers = #tpu.dot_dimension_numbers<[1], [0], [0], [1], [0, 0, 1, 1], [], []>} : vector<16x16xbf16>, vector<16x32xbf16>, vector<16x32xf32> -> vector<16x32xf32>
      %c0_37 = arith.constant 0 : index
      %c0_38 = arith.constant 0 : index
      %c64 = arith.constant 64 : index
      %62 = vector.load %arg5[%c0_37, %c0_38, %c64] : memref<1x16x128xbf16, #tpu.memory_space<vmem>>, vector<1x16x32xbf16>
      %63 = vector.shape_cast %62 : vector<1x16x32xbf16> to vector<16x32xbf16>
      %c0_39 = arith.constant 0 : index
      %c0_40 = arith.constant 0 : index
      %c64_41 = arith.constant 64 : index
      %64 = vector.load %arg6[%c0_39, %c0_40, %c64_41] : memref<1x16x128xbf16, #tpu.memory_space<vmem>>, vector<1x16x32xbf16>
      %65 = vector.shape_cast %64 : vector<1x16x32xbf16> to vector<16x32xbf16>
      %c0_42 = arith.constant 0 : index
      %c0_43 = arith.constant 0 : index
      %c64_44 = arith.constant 64 : index
      %66 = vector.load %arg7[%c0_42, %c0_43, %c64_44] : memref<1x16x128xbf16, #tpu.memory_space<vmem>>, vector<1x16x32xbf16>
      %67 = vector.shape_cast %66 : vector<1x16x32xbf16> to vector<16x32xbf16>
      %cst_45 = arith.constant dense<0.000000e+00> : vector<16x16xf32>
      %68 = tpu.matmul %63, %65, %cst_45 {dimension_numbers = #tpu.dot_dimension_numbers<[1], [1], [0], [0], [0, 0, 1, 0], [], []>} : vector<16x32xbf16>, vector<16x32xbf16>, vector<16x16xf32> -> vector<16x16xf32>
      %cst_46 = arith.constant -3.40282347E+38 : f32
      %69 = vector.shape_cast %15 : vector<1x16xi1> to vector<1x16xi1>
      %70 = vector.broadcast %69 : vector<1x16xi1> to vector<16x16xi1>
      %71 = vector.broadcast %cst_46 : f32 to vector<16x16xf32>
      %72 = arith.select %70, %68, %71 : vector<16x16xi1>, vector<16x16xf32>
      %73 = vector.extract_strided_slice %16 {offsets = [0, 2], sizes = [16, 1], strides = [1, 1]} : vector<16x4xf32> to vector<16x1xf32>
      %cst_47 = arith.constant dense<0xFF800000> : vector<16xf32>
      %74 = vector.multi_reduction <maximumf>, %72, %cst_47 [1] : vector<16x16xf32> to vector<16xf32>
      %75 = vector.shape_cast %74 : vector<16xf32> to vector<16x1xf32>
      %76 = arith.maximumf %73, %75 : vector<16x1xf32>
      %77 = vector.broadcast %76 : vector<16x1xf32> to vector<16x16xf32>
      %78 = arith.subf %72, %77 : vector<16x16xf32>
      %79 = math.exp %78 : vector<16x16xf32>
      %cst_48 = arith.constant dense<0.000000e+00> : vector<16xf32>
      %80 = vector.multi_reduction <add>, %79, %cst_48 [1] : vector<16x16xf32> to vector<16xf32>
      %81 = vector.shape_cast %80 : vector<16xf32> to vector<16x1xf32>
      %82 = arith.truncf %79 : vector<16x16xf32> to vector<16x16xbf16>
      %cst_49 = arith.constant dense<0.000000e+00> : vector<16x32xf32>
      %83 = tpu.matmul %82, %67, %cst_49 {dimension_numbers = #tpu.dot_dimension_numbers<[1], [0], [0], [1], [0, 0, 1, 1], [], []>} : vector<16x16xbf16>, vector<16x32xbf16>, vector<16x32xf32> -> vector<16x32xf32>
      %c0_50 = arith.constant 0 : index
      %c0_51 = arith.constant 0 : index
      %c96 = arith.constant 96 : index
      %84 = vector.load %arg5[%c0_50, %c0_51, %c96] : memref<1x16x128xbf16, #tpu.memory_space<vmem>>, vector<1x16x32xbf16>
      %85 = vector.shape_cast %84 : vector<1x16x32xbf16> to vector<16x32xbf16>
      %c0_52 = arith.constant 0 : index
      %c0_53 = arith.constant 0 : index
      %c96_54 = arith.constant 96 : index
      %86 = vector.load %arg6[%c0_52, %c0_53, %c96_54] : memref<1x16x128xbf16, #tpu.memory_space<vmem>>, vector<1x16x32xbf16>
      %87 = vector.shape_cast %86 : vector<1x16x32xbf16> to vector<16x32xbf16>
      %c0_55 = arith.constant 0 : index
      %c0_56 = arith.constant 0 : index
      %c96_57 = arith.constant 96 : index
      %88 = vector.load %arg7[%c0_55, %c0_56, %c96_57] : memref<1x16x128xbf16, #tpu.memory_space<vmem>>, vector<1x16x32xbf16>
      %89 = vector.shape_cast %88 : vector<1x16x32xbf16> to vector<16x32xbf16>
      %cst_58 = arith.constant dense<0.000000e+00> : vector<16x16xf32>
      %90 = tpu.matmul %85, %87, %cst_58 {dimension_numbers = #tpu.dot_dimension_numbers<[1], [1], [0], [0], [0, 0, 1, 0], [], []>} : vector<16x32xbf16>, vector<16x32xbf16>, vector<16x16xf32> -> vector<16x16xf32>
      %cst_59 = arith.constant -3.40282347E+38 : f32
      %91 = vector.shape_cast %15 : vector<1x16xi1> to vector<1x16xi1>
      %92 = vector.broadcast %91 : vector<1x16xi1> to vector<16x16xi1>
      %93 = vector.broadcast %cst_59 : f32 to vector<16x16xf32>
      %94 = arith.select %92, %90, %93 : vector<16x16xi1>, vector<16x16xf32>
      %95 = vector.extract_strided_slice %16 {offsets = [0, 3], sizes = [16, 1], strides = [1, 1]} : vector<16x4xf32> to vector<16x1xf32>
      %cst_60 = arith.constant dense<0xFF800000> : vector<16xf32>
      %96 = vector.multi_reduction <maximumf>, %94, %cst_60 [1] : vector<16x16xf32> to vector<16xf32>
      %97 = vector.shape_cast %96 : vector<16xf32> to vector<16x1xf32>
      %98 = arith.maximumf %95, %97 : vector<16x1xf32>
      %99 = vector.broadcast %98 : vector<16x1xf32> to vector<16x16xf32>
      %100 = arith.subf %94, %99 : vector<16x16xf32>
      %101 = math.exp %100 : vector<16x16xf32>
      %cst_61 = arith.constant dense<0.000000e+00> : vector<16xf32>
      %102 = vector.multi_reduction <add>, %101, %cst_61 [1] : vector<16x16xf32> to vector<16xf32>
      %103 = vector.shape_cast %102 : vector<16xf32> to vector<16x1xf32>
      %104 = arith.truncf %101 : vector<16x16xf32> to vector<16x16xbf16>
      %cst_62 = arith.constant dense<0.000000e+00> : vector<16x32xf32>
      %105 = tpu.matmul %104, %89, %cst_62 {dimension_numbers = #tpu.dot_dimension_numbers<[1], [0], [0], [1], [0, 0, 1, 1], [], []>} : vector<16x16xbf16>, vector<16x32xbf16>, vector<16x32xf32> -> vector<16x32xf32>
      %106 = tpu.concatenate %32, %54, %76, %98 in 1 : vector<16x1xf32>, vector<16x1xf32>, vector<16x1xf32>, vector<16x1xf32> -> vector<16x4xf32>
      %107 = arith.subf %16, %106 : vector<16x4xf32>
      %108 = math.exp %107 : vector<16x4xf32>
      %c0_63 = arith.constant 0 : index
      %c0_64 = arith.constant 0 : index
      %109 = vector.load %arg10[%c0_63, %c0_64] : memref<16x4xf32, #tpu.memory_space<vmem>>, vector<16x4xf32>
      tpu.vector_store %arg10[%c0_63, %c0_64], %106 {strides = array<i32>} : memref<16x4xf32, #tpu.memory_space<vmem>>, vector<16x4xf32>,
      %110 = arith.mulf %108, %17 : vector<16x4xf32>
      %111 = tpu.concatenate %37, %59, %81, %103 in 1 : vector<16x1xf32>, vector<16x1xf32>, vector<16x1xf32>, vector<16x1xf32> -> vector<16x4xf32>
      %112 = arith.addf %110, %111 : vector<16x4xf32>
      %c0_65 = arith.constant 0 : index
      %c0_66 = arith.constant 0 : index
      %113 = vector.load %arg11[%c0_65, %c0_66] : memref<16x4xf32, #tpu.memory_space<vmem>>, vector<16x4xf32>
      tpu.vector_store %arg11[%c0_65, %c0_66], %112 {strides = array<i32>} : memref<16x4xf32, #tpu.memory_space<vmem>>, vector<16x4xf32>,
      %114 = vector.extract_strided_slice %108 {offsets = [0, 0], sizes = [16, 1], strides = [1, 1]} : vector<16x4xf32> to vector<16x1xf32>
      %115 = vector.shape_cast %114 : vector<16x1xf32> to vector<16x1xf32>
      %116 = vector.broadcast %115 : vector<16x1xf32> to vector<16x32xf32>
      %117 = vector.extract_strided_slice %108 {offsets = [0, 1], sizes = [16, 1], strides = [1, 1]} : vector<16x4xf32> to vector<16x1xf32>
      %118 = vector.shape_cast %117 : vector<16x1xf32> to vector<16x1xf32>
      %119 = vector.broadcast %118 : vector<16x1xf32> to vector<16x32xf32>
      %120 = vector.extract_strided_slice %108 {offsets = [0, 2], sizes = [16, 1], strides = [1, 1]} : vector<16x4xf32> to vector<16x1xf32>
      %121 = vector.shape_cast %120 : vector<16x1xf32> to vector<16x1xf32>
      %122 = vector.broadcast %121 : vector<16x1xf32> to vector<16x32xf32>
      %123 = vector.extract_strided_slice %108 {offsets = [0, 3], sizes = [16, 1], strides = [1, 1]} : vector<16x4xf32> to vector<16x1xf32>
      %124 = vector.shape_cast %123 : vector<16x1xf32> to vector<16x1xf32>
      %125 = vector.broadcast %124 : vector<16x1xf32> to vector<16x32xf32>
      %126 = tpu.concatenate %116, %119, %122, %125 in 1 : vector<16x32xf32>, vector<16x32xf32>, vector<16x32xf32>, vector<16x32xf32> -> vector<16x128xf32>
      %c0_67 = arith.constant 0 : index
      %c0_68 = arith.constant 0 : index
      %127 = vector.load %arg12[%c0_67, %c0_68] : memref<16x128xf32, #tpu.memory_space<vmem>>, vector<16x128xf32>
      %128 = arith.mulf %126, %127 : vector<16x128xf32>
      %129 = tpu.concatenate %39, %61, %83, %105 in 1 : vector<16x32xf32>, vector<16x32xf32>, vector<16x32xf32>, vector<16x32xf32> -> vector<16x128xf32>
      %130 = arith.addf %128, %129 : vector<16x128xf32>
      %c0_69 = arith.constant 0 : index
      %c0_70 = arith.constant 0 : index
      %131 = vector.load %arg12[%c0_69, %c0_70] : memref<16x128xf32, #tpu.memory_space<vmem>>, vector<16x128xf32>
      tpu.vector_store %arg12[%c0_69, %c0_70], %130 {strides = array<i32>} : memref<16x128xf32, #tpu.memory_space<vmem>>, vector<16x128xf32>,
    } else {
    }
    %c0_i32_2 = arith.constant 0 : i32
    %9 = arith.cmpi eq, %arg2, %c0_i32_2 : i32
    %10 = arith.extui %9 : i1 to i32
    %c0_i32_3 = arith.constant 0 : i32
    %11 = arith.cmpi ne, %10, %c0_i32_3 : i32
    scf.if %11 {
      %c0 = arith.constant 0 : index
      %c0_4 = arith.constant 0 : index
      %12 = vector.load %arg11[%c0, %c0_4] : memref<16x4xf32, #tpu.memory_space<vmem>>, vector<16x4xf32>
      %13 = tpu.reciprocal %12 {approx = true} : vector<16x4xf32> -> vector<16x4xf32>
      %14 = vector.extract_strided_slice %13 {offsets = [0, 0], sizes = [16, 1], strides = [1, 1]} : vector<16x4xf32> to vector<16x1xf32>
      %15 = vector.shape_cast %14 : vector<16x1xf32> to vector<16x1xf32>
      %16 = vector.broadcast %15 : vector<16x1xf32> to vector<16x32xf32>
      %17 = vector.extract_strided_slice %13 {offsets = [0, 1], sizes = [16, 1], strides = [1, 1]} : vector<16x4xf32> to vector<16x1xf32>
      %18 = vector.shape_cast %17 : vector<16x1xf32> to vector<16x1xf32>
      %19 = vector.broadcast %18 : vector<16x1xf32> to vector<16x32xf32>
      %20 = vector.extract_strided_slice %13 {offsets = [0, 2], sizes = [16, 1], strides = [1, 1]} : vector<16x4xf32> to vector<16x1xf32>
      %21 = vector.shape_cast %20 : vector<16x1xf32> to vector<16x1xf32>
      %22 = vector.broadcast %21 : vector<16x1xf32> to vector<16x32xf32>
      %23 = vector.extract_strided_slice %13 {offsets = [0, 3], sizes = [16, 1], strides = [1, 1]} : vector<16x4xf32> to vector<16x1xf32>
      %24 = vector.shape_cast %23 : vector<16x1xf32> to vector<16x1xf32>
      %25 = vector.broadcast %24 : vector<16x1xf32> to vector<16x32xf32>
      %26 = tpu.concatenate %16, %19, %22, %25 in 1 : vector<16x32xf32>, vector<16x32xf32>, vector<16x32xf32>, vector<16x32xf32> -> vector<16x128xf32>
      %c0_5 = arith.constant 0 : index
      %c0_6 = arith.constant 0 : index
      %c0_7 = arith.constant 0 : index
      %27 = vector.load %arg8[%c0_5, %c0_6, %c0_7] : memref<1x16x128xbf16, #tpu.memory_space<vmem>>, vector<1x16x128xbf16>
      %28 = vector.shape_cast %27 : vector<1x16x128xbf16> to vector<16x128xbf16>
      %29 = arith.extf %28 : vector<16x128xbf16> to vector<16x128xf32>
      %30 = arith.negf %29 : vector<16x128xf32>
      %31 = math.exp %30 : vector<16x128xf32>
      %cst = arith.constant 1.000000e+00 : f32
      %32 = vector.broadcast %cst : f32 to vector<16x128xf32>
      %33 = arith.addf %32, %31 : vector<16x128xf32>
      %34 = arith.divf %32, %33 : vector<16x128xf32>
      %c0_8 = arith.constant 0 : index
      %c0_9 = arith.constant 0 : index
      %35 = vector.load %arg12[%c0_8, %c0_9] : memref<16x128xf32, #tpu.memory_space<vmem>>, vector<16x128xf32>
      %36 = arith.mulf %35, %26 : vector<16x128xf32>
      %37 = arith.mulf %36, %34 : vector<16x128xf32>
      %38 = arith.truncf %37 : vector<16x128xf32> to vector<16x128xbf16>
      %c0_10 = arith.constant 0 : index
      %c0_11 = arith.constant 0 : index
      %c0_12 = arith.constant 0 : index
      %39 = vector.load %arg9[%c0_10, %c0_11, %c0_12] : memref<1x16x128xbf16, #tpu.memory_space<vmem>>, vector<1x16x128xbf16>
      %40 = vector.shape_cast %39 : vector<1x16x128xbf16> to vector<16x128xbf16>
      %41 = vector.shape_cast %38 : vector<16x128xbf16> to vector<1x16x128xbf16>
      tpu.vector_store %arg9[%c0_10, %c0_11, %c0_12], %41 {strides = array<i32>} : memref<1x16x128xbf16, #tpu.memory_space<vmem>>, vector<1x16x128xbf16>,
    } else {
    }
    return
  }
  func.func @transform_0(%arg0: i32, %arg1: i32, %arg2: i32, %arg3: memref<2xi32, #tpu.memory_space<smem>>) -> (i32, i32, i32) {
    %c0_i32 = arith.constant 0 : i32
    %c0_i32_0 = arith.constant 0 : i32
    return %arg0, %c0_i32, %arg2 : i32, i32, i32
  }
  func.func @transform_1(%arg0: i32, %arg1: i32, %arg2: i32, %arg3: memref<2xi32, #tpu.memory_space<smem>>) -> (i32, i32, i32) {
    %c0_i32 = arith.constant 0 : i32
    %c0_i32_0 = arith.constant 0 : i32
    return %arg0, %arg1, %c0_i32 : i32, i32, i32
  }
  func.func @transform_2(%arg0: i32, %arg1: i32, %arg2: i32, %arg3: memref<2xi32, #tpu.memory_space<smem>>) -> (i32, i32, i32) {
    %c1_i32 = arith.constant 1 : i32
    %c0_i32 = arith.constant 0 : i32
    return %arg0, %arg2, %c1_i32 : i32, i32, i32
  }
  func.func @transform_3(%arg0: i32, %arg1: i32, %arg2: i32, %arg3: memref<2xi32, #tpu.memory_space<smem>>) -> (i32, i32, i32) {
    %c2_i32 = arith.constant 2 : i32
    %c0_i32 = arith.constant 0 : i32
    return %arg0, %arg2, %c2_i32 : i32, i32, i32
  }
  func.func @transform_4(%arg0: i32, %arg1: i32, %arg2: i32, %arg3: memref<2xi32, #tpu.memory_space<smem>>) -> (i32, i32, i32) {
    %c3_i32 = arith.constant 3 : i32
    %c0_i32 = arith.constant 0 : i32
    return %arg0, %arg1, %c3_i32 : i32, i32, i32
  }
  func.func @transform_5(%arg0: i32, %arg1: i32, %arg2: i32, %arg3: memref<2xi32, #tpu.memory_space<smem>>) -> (i32, i32, i32) {
    %c0_i32 = arith.constant 0 : i32
    %c0_i32_0 = arith.constant 0 : i32
    return %arg0, %arg1, %c0_i32 : i32, i32, i32
  }
}

</mosaic_0001>

<bundles_post_ra>
// kernel: attention_forward.5
= control target key start
LH: loop header
LB: loop body
LE: loop exit
PB: predicated region body
PF: predicated region fallthrough
CT: control target
= control target key end

     0   :  { %vm17_vm0 = vcmask 523264   ;;  %v269_v2 = vmov 0.0   ;;  %s342_s0 = inlined_call_operand.vmem [shape: bf16[32,128], index: 0, kind: input, shape index: {}]   ;;  %s343_s1 = inlined_call_operand.vmem [shape: bf16[128,64], index: 1, kind: input, shape index: {}]   ;;  %s344_s2 = inlined_call_operand.hbm [shape: f32[32,64], index: 2, kind: output, shape index: {}]  }
   0x1   :  { %v235_v0 = vld [vmem:[%s343_s1] sm:$0xff]   ;;  %v236_v1 = vld [vmem:[%s343_s1 + $0x8] sm:$0xff]   ;;  %20 = vst.msk [vmem:[#allocation2 + $0x10] sm:$0xff] %vm17_vm0, %v269_v2  ;;  %18 = vst.msk [vmem:[#allocation2] sm:$0xff] %vm17_vm0, %v269_v2 }
   0x2   :  { %211 = vmatprep.subr.bf16.mxu0 %v235_v0  ;;  %19 = vst.msk [vmem:[#allocation2 + $0x8] sm:$0xff] %vm17_vm0, %v269_v2  ;;  %21 = vst.msk [vmem:[#allocation2 + $0x18] sm:$0xff] %vm17_vm0, %v269_v2  ;;  %v237_v3 = vld [vmem:[%s343_s1 + $0x10] sm:$0xff]   ;;  %v238_v4 = vld [vmem:[%s343_s1 + $0x18] sm:$0xff]  }
   0x3   :  { %212 = vmatpush3.bf16.msra.mxu0 %v235_v0  ;;  %v243_v5 = vld [vmem:[%s342_s0] sm:$0xff]  }
   0x4   :  { %213 = vmatprep.subr.bf16.mxu0 %v236_v1  ;;  %227 = vmatprep.mubr.bf16.mxu0 %v243_v5 }
   0x7   :  { %214 = vmatpush3.bf16.msra.mxu0 %v236_v1 }
   0x8   :  { %215 = vmatprep.subr.bf16.mxu0 %v237_v3 }
   0x9   :  { %7 = vsyncpa [#allocation4], 0  ;;  %v239_v6 = vld [vmem:[%s343_s1 + $0x20] sm:$0xff]   ;;  %v240_v7 = vld [vmem:[%s343_s1 + $0x28] sm:$0xff]  }
   0xa   :  { %v241_v8 = vld [vmem:[%s343_s1 + $0x30] sm:$0xff]   ;;  %v242_v9 = vld [vmem:[%s343_s1 + $0x38] sm:$0xff]   ;;  %v244_v10 = vld [vmem:[%s342_s0 + $0x8] sm:$0xff]   ;;  %s270_s0 = smov [#allocation3]  }
   0xb   :  { %216 = vmatpush3.bf16.msra.mxu0 %v237_v3  ;;  %v24_v11 = vld [vmem:[#allocation2 + $0x10] sm:$0xff]  ;;  %v22_v12 = vld [vmem:[#allocation2] sm:$0xff]  ;;  %v25_v14 = vld [vmem:[#allocation2 + $0x18] sm:$0xff]  ;;  %s180_s1 = sshll.u32 %s270_s0, 4  ;;  %s181_s1 = int_to_ptr.vmem [resolvable:$true] %s180_s1 }
   0xc   :  { %217 = vmatprep.subr.bf16.mxu0 %v238_v4  ;;  %v23_v17 = vld [vmem:[#allocation2 + $0x8] sm:$0xff]  ;;  %s245_s29 = scalar_lea.vmem %s181_s1, 512  ;;  %p250_p1 = scmp.lt.s32.totalorder %s181_s1, %s181_s1 }
   0xd   :  { %p246_p0 = scmp.ne.s32.totalorder %s181_s1, %s245_s29  ;;  %p251_p2 = scmp.lt.s32.totalorder %s245_s29, %s245_s29 }
   0xf   :  { %218 = vmatpush3.bf16.msra.mxu0 %v238_v4  ;;  %p252_p3 = por %p251_p2, %p250_p1 }
  0x10   :  { %219 = vmatprep.subr.bf16.mxu0 %v239_v6 }
  0x11   :  { %p253_p4 = pnand %p252_p3, %p246_p0 }
  0x13   :  { %220 = vmatpush3.bf16.msra.mxu0 %v239_v6 }
  0x14   :  { %221 = vmatprep.subr.bf16.mxu0 %v240_v7 }
  0x17   :  { %222 = vmatpush3.bf16.msra.mxu0 %v240_v7 }
  0x18   :  { %223 = vmatprep.subr.bf16.mxu0 %v241_v8 }
  0x1b   :  { %224 = vmatpush3.bf16.msra.mxu0 %v241_v8 }
  0x1c   :  { %225 = vmatprep.subr.bf16.mxu0 %v242_v9 }
  0x1f   :  { %226 = vmatpush3.bf16.msra.mxu0 %v242_v9 }
  0x22   :  { %228 = vmatmul.mubr.bf16.vlgmr.msra.gmra.mrb[0].mxu0 %v244_v10 }
  0xf5   :  { %v229_v13 = vpop.f32.mrb[0].mxu0 }
  0xf6   :  { %v157_v15 = vadd.f32 %v229_v13, %v24_v11  ;;  %v140_v16 = vpop.f32.mrb[1].mxu0 }
  0xf7   :  { %v155_v18 = vadd.f32 %v140_v16, %v22_v12  ;;  %v230_v19 = vpop.f32.mrb[2].mxu0 }
  0xf8   :  { %162 = vst.msk [vmem:[#allocation2 + $0x10] sm:$0xff] %vm17_vm0, %v157_v15  ;;  %v158_v20 = vadd.f32 %v230_v19, %v25_v14  ;;  %v143_v21 = vpop.f32.mrb[3].mxu0 }
  0xf9   :  { %160 = vst.msk [vmem:[#allocation2] sm:$0xff] %vm17_vm0, %v155_v18  ;;  %v156_v22 = vadd.f32 %v143_v21, %v23_v17 }
  0xfa   :  { %163 = vst.msk [vmem:[#allocation2 + $0x18] sm:$0xff] %vm17_vm0, %v158_v20 }
  0xfb   :  { %161 = vst.msk [vmem:[#allocation2 + $0x8] sm:$0xff] %vm17_vm0, %v156_v22 }
  0xff   :  { %v169_v23 = vld [vmem:[#allocation2 + $0x10] sm:$0xff] }
 0x100   :  { %v167_v24 = vld [vmem:[#allocation2] sm:$0xff]  ;;  %173 = vst.msk [vmem:[#allocation3 + $0x10] sm:$0xff] %vm17_vm0, %v169_v23 }
 0x101   :  { %v170_v25 = vld [vmem:[#allocation2 + $0x18] sm:$0xff]  ;;  %171 = vst.msk [vmem:[#allocation3] sm:$0xff] %vm17_vm0, %v167_v24 }
 0x102   :  { %v168_v26 = vld [vmem:[#allocation2 + $0x8] sm:$0xff]  ;;  %174 = vst.msk [vmem:[#allocation3 + $0x18] sm:$0xff] %vm17_vm0, %v170_v25 }
 0x103   :  { %172 = vst.msk [vmem:[#allocation3 + $0x8] sm:$0xff] %vm17_vm0, %v168_v26 }
 0x104   :  { %256 = shalt.err (!%p253_p4)
}
 0x105   :  { %s257_s4 = scalar_lea.hbm %s344_s2, 512 }
 0x106   :  { %p258_p5 = scmp.ne.s32.totalorder %s344_s2, %s257_s4  ;;  %p261_p6 = scmp.lt.u32.totalorder %s257_s4, %s344_s2 }
 0x108   :  { %p263_p7 = pnand %p261_p6, %p258_p5 }
 0x10a   :  { %266 = shalt.err (!%p263_p7)
}
 0x10b   :  { %s271_s9 = smov 128   ;;  %s272_s10 = smov 8  }
 0x10c   :  { %186 = dma.vmem_to_hbm [thread:$0]  %s181_s1, 512, %s344_s2, [#allocation4], %s271_s9, %s271_s9, %s272_s10  }
 0x10d   :  { %267 = dma.done.wait [#allocation4], 512  }
 0x10e   :  { %268 = vsyncadd [#allocation4], 4294966784 }
 0x10f   :  { %190 = vsyncpa [#allocation4], 1 }

// kernel: attention_forward.3
= control target key start
LH: loop header
LB: loop body
LE: loop exit
PB: predicated region body
PF: predicated region fallthrough
CT: control target
= control target key end

     0   :  { %8 = vsyncpa [#allocation4], 0  ;;  %s1021_s0 = inlined_call_operand.vmem [shape: bf16[32,64], index: 0, kind: input, shape index: {}]   ;;  %s1022_s1 = inlined_call_operand.hbm [shape: bf16[64,512], index: 1, kind: input, shape index: {}]   ;;  %s1023_s2 = inlined_call_operand.vmem [shape: f32[1,512], index: 2, kind: input, shape index: {}]   ;;  %s1024_s3 = inlined_call_operand.vmem [shape: bf16[32,512], index: 3, kind: output, shape index: {}]  }
   0x1   :  { %10 = vsyncpa [#allocation4 + $0x1], 0  ;;  %s875_s12 = smov 0   ;;  %s877_s13 = smov 0  }
   0x2   :  { %s879_s14 = smov 0   ;;  %s881_s15 = smov 0  }
   0x3   :  { %s883_s16 = smov 0   ;;  %s885_s17 = smov 0  }
   0x4 LB: > { %s648_s18 = sadd.s32 4294967295, %s848_s17   ;;  %s31_s19 = sadd.s32 1, %s844_s16  ;;  %s848_s17 = sphi %s885_s17, %s16_s17   ;;  %s844_s16 = sphi %s883_s16, %s1035_s16   ;;  %s840_s15 = sphi %s881_s15, %s1034_s15   ;;  %s836_s14 = sphi %s879_s14, %s1033_s14   ;;  %s832_s13 = sphi %s877_s13, %s1032_s13   ;;  %s828_s12 = sphi %s875_s12, %s1031_s12  }
   0x5   : > { %p33_p0 = scmp.ge.s32.totalorder %s31_s19, 2  ;;  %s72_s20 = sadd.s32 1, %s836_s14 }
   0x6   : > { %p79_p1 = scmp.ne.s32.totalorder %s836_s14, %s832_s13  ;;  %p80_p2 = scmp.eq.s32.totalorder %s848_s17, 0 }
   0x7   : > { %s1037_s19 = smov (%p33_p0, %s31_s19), 0  ;;  %p85_p4 = scmp.ne.s32.totalorder %s832_s13, %s828_s12 }
   0x8   : > { %p911_p3 = por %p80_p2, %p79_p1  ;;  %s68_s22 = ssub.s32 %s844_s16, %s1037_s19 }
   0x9   : > { %p86_p5 = scmp.eq.s32.totalorder %s648_s18, 0  ;;  %p70_p6 = scmp.eq.s32.totalorder %s68_s22, 0 }
   0xa   : > { %p137_p7 = scmp.eq.s32.totalorder %s648_s18, 1  ;;  %p701_p10 = scmp.lt.s32.totalorder %s848_s17, 2 }
   0xb   : > { %p918_p8 = por %p86_p5, %p85_p4  ;;  %s175_s26 = sand.u32 1, %s836_s14  }
   0xc   : > { %s923_s24 = scalar_select %p70_p6, %s836_s14, %s72_s20  }
   0xd   : > { %p925_p9 = por %p137_p7, %p79_p1  ;;  %s681_s27 = sshll.u32 %s844_s16, 7 }
   0xe   : > { %s653_s28 = sshll.u32 %s175_s26, 6  ;;  %s935_s4 = scalar_lea.hbm %s1022_s1, %s681_s27 }
   0xf   : > { %s1027_s25 = scalar_select %p925_p9, 1, 0 }
  0x10   : > { %s179_s5 = scalar_lea.vmem [#allocation3], %s653_s28  ;;  %p939_p11 = pnand %p701_p10, %p911_p3 }
  0x11   : > { %s189_s6 = sshll.u32 %s179_s5, 4  ;;  %s946_s8 = scalar_lea.sflag [#allocation4], %s175_s26  ;;  %s943_s6 = int_to_ptr.vmem [resolvable:$true] %s189_s6 }
  0x12   : > { %s768_s9 = scalar_lea.hbm %s935_s4, 1024  ;;  %p770_p0 = pneg %p939_p11 }
  0x13   : > { %p769_p13 = scmp.ne.s32.totalorder %s935_s4, %s768_s9  ;;  %s773_s12 = scalar_lea.hbm %s1022_s1, 2048 }
  0x14   : > { %p774_p3 = scmp.lt.u32.totalorder %s935_s4, %s1022_s1  ;;  %p775_p4 = scmp.lt.u32.totalorder %s773_s12, %s768_s9 }
  0x15   : > { %p771_p1 = pnand %p770_p0, %p769_p13  ;;  %p777_p6 = scmp.lt.u32.totalorder %s768_s9, %s935_s4 }
  0x16   : > { %p776_p5 = por %p775_p4, %p774_p3 }
  0x17   : > { %p772_p2 = pneg %p771_p1 }
  0x18   : > { %p778_p7 = por %p777_p6, %p776_p5 }
  0x1a   : > { %p779_p10 = pnand %p778_p7, %p772_p2 }
  0x1c   : > { %782 = shalt.err (!%p779_p10)
}
  0x1d   : > { %s783_s21 = scalar_lea.vmem %s943_s6, 1024  ;;  %s850_s22 = smov [#allocation3]  }
  0x1e   : > { %p784_p13 = scmp.ne.s32.totalorder %s943_s6, %s783_s21  ;;  %s788_s26 = sshll.u32 %s850_s22, 4  ;;  %s789_s26 = int_to_ptr.vmem [resolvable:$false] %s788_s26 }
  0x1f   : > { %s790_s27 = scalar_lea.vmem %s789_s26, 2048  ;;  %p791_p9 = scmp.lt.s32.totalorder %s943_s6, %s789_s26 }
  0x20   : > { %p786_p1 = pnand %p784_p13, %p770_p0  ;;  %p792_p3 = scmp.lt.s32.totalorder %s790_s27, %s783_s21 }
  0x22   : > { %p787_p12 = pneg %p786_p1  ;;  %p793_p4 = por %p792_p3, %p791_p9 }
  0x24   : > { %p794_p5 = pnand %p793_p4, %p787_p12 }
  0x26   : > { %797 = shalt.err (!%p794_p5)
}
  0x27   : > { %s851_s28 = smov 256   ;;  %s852_s29 = smov 128  }
  0x28   : > { %s853_s30 = smov 8   ;;  %p205_p0 = scmp.lt.s32.totalorder %s848_s17, 3 }
  0x29   : > { %700 = dma.hbm_to_vmem [thread:$0]  (!%p939_p11), %s935_s4, 1024, %s943_s6, %s946_s8, %s851_s28, %s852_s29, %s853_s30  }
  0x2a   : > { %p1029_p2 = scmp.ge.s32.totalorder %s848_s17, 1 }
  0x2c   : > { %p206_p6 = pnand %p1029_p2, %p205_p0 }
  0x2d   : > { %s978_s5 = sand.u32 (!%p206_p6), 1, %s832_s13  }
  0x2e   : > { %209 = sbr.rel (%p206_p6) target bundleno = 300 (0x12c), region = 32  ;;  %s657_s9 = sshll.u32 (!%p206_p6), %s978_s5, 6 }
  0x2f   : > { %s212_s10 = scalar_lea.sflag (!%p206_p6), [#allocation4], %s978_s5  ;;  %s215_s11 = scalar_lea.vmem (!%p206_p6), [#allocation3], %s657_s9 }
  0x35   : > { %823 = dma.done.wait (%p918_p8), %s212_s10, 1024  }
  0x36   : > { %825 = vsyncadd (%p918_p8), %s212_s10, 4294966272  ;;  %v854_v0 = vmov 0   ;;  %v754_v1 = vld [vmem:[%s215_s11 + $0x4] ss:$8 sps:$4 sm:$0xff]   ;;  %v756_v2 = vld [vmem:[%s215_s11] ss:$8 sps:$4 sm:$0xff]   ;;  %v439_v11 = vlaneseq }
  0x37   : > { %389 = vmatprep.mubr.bf16.mxu0 %v854_v0  ;;  %399 = vmatprep.mubr.bf16.mxu1 %v854_v0  ;;  %v757_v3 = vld [vmem:[%s215_s11 + $0x14] ss:$8 sps:$4 sm:$0xff]   ;;  %v759_v4 = vld [vmem:[%s215_s11 + $0x10] ss:$8 sps:$4 sm:$0xff]   ;;  %v760_v5 = vld [vmem:[%s215_s11 + $0x24] ss:$8 sps:$4 sm:$0xff]  }
  0x38   : > { %357 = vmatprep.subr.bf16.mxu0 %v754_v1  ;;  %687 = vmatprep.subr.bf16.mxu1 %v754_v1  ;;  %v762_v6 = vld [vmem:[%s215_s11 + $0x20] ss:$8 sps:$4 sm:$0xff]   ;;  %v763_v7 = vld [vmem:[%s215_s11 + $0x34] ss:$8 sps:$4 sm:$0xff]   ;;  %v765_v8 = vld [vmem:[%s215_s11 + $0x30] ss:$8 sps:$4 sm:$0xff]  }
  0x39   : > { %358 = vmatpush1.bf16.msra.mxu0 %v756_v2  ;;  %691 = vmatpush1.bf16.msra.mxu1 %v756_v2  ;;  %v766_v9 = vld [vmem:[%s1021_s0] sm:$0xff]   ;;  %v767_v10 = vld [vmem:[%s1021_s0 + $0x8] sm:$0xff]   ;;  %vm350_vm0 = vcmask 523264   ;;  %s659_s8 = sshll.u32 %s840_s15, 1  ;;  %v440_v12 = vshrl.u32 %v439_v11, 7  ;;  %s658_s21 = sshll.u32 %s978_s5, 5 }
  0x3a   : > { %359 = vmatprep.subr.bf16.mxu0 %v757_v3  ;;  %688 = vmatprep.subr.bf16.mxu1 %v757_v3  ;;  %p261_p8 = scmp.lt.s32.totalorder %s659_s8, 3  ;;  %s248_s22 = scalar_lea.vmem [#allocation5], %s658_s21 }
  0x3b   : > { %v441_v13 = vsub.s32 0, %v440_v12  ;;  %v445_v15 = vsub.s32 1, %v440_v12  ;;  %p1030_p9 = scmp.ne.s32.totalorder %s1027_s25, 0 }
  0x3c   : > { %s1039_s8 = smov (!%p261_p8, %s659_s8), 3  ;;  %s686_s26 = sshll.u32 (%p1030_p9), %s840_s15, 3 }
  0x3d   : > { %360 = vmatpush1.bf16.msra.mxu0 %v759_v4  ;;  %692 = vmatpush1.bf16.msra.mxu1 %v759_v4  ;;  %s263_s20 = scalar_lea.vmem %s1023_s2, %s1039_s8  ;;  %s497_s29 = scalar_lea.vmem (%p1030_p9), %s1024_s3, %s686_s26 }
  0x3e   : > { %361 = vmatprep.subr.bf16.mxu0 %v760_v5  ;;  %689 = vmatprep.subr.bf16.mxu1 %v760_v5  ;;  %v437_v14 = vld [vmem:[%s263_s20] sm:$0x3] }
  0x3f   : > { %v442_v16 = vrot.slane %v437_v14, %v441_v13  ;;  %v446_v17 = vrot.slane %v437_v14, %v445_v15 }
  0x41   : > { %362 = vmatpush1.bf16.msra.mxu0 %v762_v6  ;;  %693 = vmatpush1.bf16.msra.mxu1 %v762_v6 }
  0x42   : > { %363 = vmatprep.subr.bf16.mxu0 %v763_v7  ;;  %690 = vmatprep.subr.bf16.mxu1 %v763_v7 }
  0x45   : > { %364 = vmatpush1.bf16.msra.mxu0 %v765_v8  ;;  %694 = vmatpush1.bf16.msra.mxu1 %v765_v8 }
  0x48   : > { %670 = vmatmul.mubr.msk.bf16.vlgmr.msra.gmra.mrb[0].mxu0 %vm350_vm0, %v766_v9  ;;  %671 = vmatmul.mubr.msk.bf16.vlgmr.msra.gmra.mrb[0].mxu1 %vm350_vm0, %v767_v10 }
 0x11b   : > { %v391_v18 = vpop.f32.mrb[0].mxu0  ;;  %v401_v19 = vpop.f32.mrb[0].mxu1 }
 0x11c   : > { %v449_v20 = vadd.f32 %v442_v16, %v391_v18  ;;  %v453_v21 = vadd.f32 %v442_v16, %v401_v19  ;;  %v393_v22 = vpop.f32.mrb[1].mxu0  ;;  %v403_v23 = vpop.f32.mrb[1].mxu1 }
 0x11d   : > { %v450_v24 = vadd.f32 %v446_v17, %v393_v22  ;;  %v454_v25 = vadd.f32 %v446_v17, %v403_v23  ;;  %v395_v26 = vpop.f32.mrb[2].mxu0  ;;  %v405_v27 = vpop.f32.mrb[2].mxu1  ;;  %491 = sbr.rel (!%p1030_p9) target bundleno = 300 (0x12c), region = 48 }
 0x11e   : > { %v451_v28 = vadd.f32 %v442_v16, %v395_v26  ;;  %v455_v29 = vadd.f32 %v442_v16, %v405_v27  ;;  %v397_v30 = vpop.f32.mrb[3].mxu0  ;;  %v407_v31 = vpop.f32.mrb[3].mxu1 }
 0x11f   : > { %v682_v32 = vpack.c.bf16 %v450_v24, %v449_v20  ;;  %v684_v33 = vpack.c.bf16 %v454_v25, %v453_v21  ;;  %v452_v34 = vadd.f32 %v446_v17, %v397_v30  ;;  %v456_v35 = vadd.f32 %v446_v17, %v407_v31 }
 0x121   : > { %481 = vst [vmem:[%s248_s22] sm:$0xff] %v682_v32  ;;  %483 = vst [vmem:[%s248_s22 + $0x10] sm:$0xff] %v684_v33  ;;  %v683_v36 = vpack.c.bf16 %v452_v34, %v451_v28  ;;  %v685_v37 = vpack.c.bf16 %v456_v35, %v455_v29 }
 0x123   : > { %482 = vst [vmem:[%s248_s22 + $0x8] sm:$0xff] %v683_v36  ;;  %484 = vst [vmem:[%s248_s22 + $0x18] sm:$0xff] %v685_v37 }
 0x128   : > { %v531_v38 = vld [vmem:[%s248_s22] sm:$0xff]  ;;  %v535_v40 = vld [vmem:[%s248_s22 + $0x10] sm:$0xff] }
 0x129   : > { %532 = vst [vmem:[%s497_s29] sm:$0xff] %v531_v38  ;;  %536 = vst [vmem:[%s497_s29 + $0x20] sm:$0xff] %v535_v40 }
 0x12a   : > { %v533_v39 = vld [vmem:[%s248_s22 + $0x8] sm:$0xff]  ;;  %v537_v41 = vld [vmem:[%s248_s22 + $0x18] sm:$0xff] }
 0x12b   : > { %534 = vst [vmem:[%s497_s29 + $0x10] sm:$0xff] %v533_v39  ;;  %538 = vst [vmem:[%s497_s29 + $0x30] sm:$0xff] %v537_v41 }
 0x12c PF: > { %s16_s17 = sadd.s32 1, %s848_s17   ;;  %s1031_s12 = smov %s832_s13 }
 0x12d   : > { %p13_p11 = scmp.ge.s32.totalorder %s16_s17, 4   ;;  %s1032_s13 = smov %s836_s14 }
 0x12e   : > { %s1033_s14 = smov %s923_s24  ;;  %s1034_s15 = smov %s844_s16 }
 0x12f   : > { %s1035_s16 = smov %s1037_s19  ;;  %15 = sbr.rel (!%p13_p11) target bundleno = 4 (0x4), region = 124 }
 0x136   :  { %554 = vsyncpa [#allocation4], 1 }
 0x137   :  { %556 = vsyncpa [#allocation4 + $0x1], 1 }

// kernel: attention_forward.4
= control target key start
LH: loop header
LB: loop body
LE: loop exit
PB: predicated region body
PF: predicated region fallthrough
CT: control target
= control target key end

     0   :  { %s2155_s0 = inlined_call_operand.vmem [shape: s32[2], index: 0, kind: input, shape index: {}]   ;;  %s2156_s1 = inlined_call_operand.vmem [shape: s32[2,1,16], index: 1, kind: input, shape index: {}]   ;;  %s2157_s2 = inlined_call_operand.vmem [shape: bf16[2,16,512], index: 2, kind: input, shape index: {}, may-alias: {2,3,4,5}]   ;;  %s2158_s3 = inlined_call_operand.vmem [shape: bf16[2,16,512], index: 3, kind: input, shape index: {}, may-alias: {2,3,4,5}]   ;;  %s2159_s4 = inlined_call_operand.vmem [shape: bf16[2,16,512], index: 4, kind: input, shape index: {}, may-alias: {2,3,4,5}]   ;;  %s2160_s5 = inlined_call_operand.vmem [shape: bf16[2,16,512], index: 5, kind: input, shape index: {}, may-alias: {2,3,4,5}]   ;;  %s2161_s6 = inlined_call_operand.vmem [shape: bf16[2,16,128], index: 6, kind: output, shape index: {}]  }
   0x1   :  { %s11_s23 = sshll.u32 %s2155_s0, 4  ;;  %s12_s23 = int_to_ptr.vmem [resolvable:$true] %s11_s23 }
   0x2   :  { %s1731_s24 = scalar_lea.vmem %s12_s23, 16  ;;  %p1736_p1 = scmp.lt.s32.totalorder %s12_s23, %s12_s23 }
   0x3   :  { %p1732_p0 = scmp.ne.s32.totalorder %s12_s23, %s1731_s24  ;;  %p1737_p2 = scmp.lt.s32.totalorder %s1731_s24, %s1731_s24 }
   0x5   :  { %p1738_p3 = por %p1737_p2, %p1736_p1 }
   0x7   :  { %p1739_p4 = pnand %p1738_p3, %p1732_p0 }
   0x9   :  { %1742 = shalt.err (!%p1739_p4)  }
   0xa   :  { %s1785_s25 = smov [#allocation6]  }
   0xb   :  { %14 = dma.vmem_to_smem %s12_s23, 16, %s1785_s25, [#allocation5] }
   0xc   :  { %1763 = dma.done.wait [#allocation5], 16 }
   0xd   :  { %1764 = vsyncadd [#allocation5], 4294967280 }
   0xe   :  { %16 = sfence }
   0xf   :  { %s1839_s26 = smov 0   ;;  %s1841_s27 = smov 0  }
  0x10   :  { %s1843_s28 = smov 0   ;;  %s1845_s0 = smov 0  }
  0x11   :  { %s1847_s29 = smov 0  }
  0x12 LB: > { %s41_s30 = sadd.s32 1, %s1779_s0  ;;  %p85_p6 = scmp.ne.s32.totalorder %s1771_s27, %s1767_s26  ;;  %s1783_s29 = sphi %s1847_s29, %s22_s29   ;;  %s1779_s0 = sphi %s1845_s0, %s2166_s0   ;;  %s1775_s28 = sphi %s1843_s28, %s2165_s28   ;;  %s1771_s27 = sphi %s1841_s27, %s2164_s27   ;;  %s1767_s26 = sphi %s1839_s26, %s2163_s26  }
  0x13   : > { %p43_p5 = scmp.ge.s32.totalorder %s41_s30, 2  ;;  %p86_p7 = scmp.eq.s32.totalorder %s1783_s29, 0 }
  0x14   : > { %s78_s9 = sadd.s32 1, %s1771_s27  ;;  %p1495_p10 = scmp.ge.s32.totalorder %s1783_s29, 2 }
  0x15   : > { %s2168_s30 = smov (%p43_p5, %s41_s30), 0  ;;  %p1870_p8 = por %p86_p7, %p85_p6 }
  0x16   : > { %s73_s8 = ssub.s32 %s1779_s0, %s2168_s30  ;;  %223 = sbr.rel (%p1495_p10) target bundleno = 57 (0x39), region = 16 }
  0x17   : > { %p76_p9 = scmp.eq.s32.totalorder %s73_s8, 0 }
  0x19   : > { %s1878_s10 = scalar_select %p76_p9, %s1771_s27, %s78_s9  }
  0x1d   : > { %235 = sbr.rel (!%p1870_p8) target bundleno = 36 (0x24), region = 24  ;;  %s237_s11 = sand.u32 (%p1870_p8), 1, %s1771_s27  }
  0x1e   : > { %s1540_s12 = sshll.u32 (%p1870_p8), %s1779_s0, 5  ;;  %s1496_s13 = sshll.u32 (%p1870_p8), %s237_s11, 3 }
  0x1f   : > { %s245_s16 = scalar_lea.vmem (%p1870_p8), %s2157_s2, %s1540_s12  ;;  %s239_s17 = scalar_lea.vmem (%p1870_p8), [#allocation7], %s1496_s13 }
  0x20   : > { %v261_v0 = vld [vmem:[%s245_s16] sm:$0xf] (%p1870_p8)  ;;  %v263_v1 = vld [vmem:[%s245_s16 + $0x10] sm:$0xf] (%p1870_p8) }
  0x21   : > { %262 = vst [vmem:[%s239_s17] sm:$0xf] (%p1870_p8), %v261_v0  ;;  %264 = vst [vmem:[%s239_s17 + $0x4] sm:$0xf] (%p1870_p8), %v263_v1 }
  0x24 PF: > { %291 = sbr.rel (!%p1870_p8) target bundleno = 43 (0x2b), region = 65  ;;  %s293_s18 = sand.u32 (%p1870_p8), 1, %s1771_s27  }
  0x25   : > { %s1541_s19 = sshll.u32 (%p1870_p8), %s1779_s0, 5  ;;  %s1499_s20 = sshll.u32 (%p1870_p8), %s293_s18, 3 }
  0x26   : > { %s1366_s23 = scalar_lea.vmem (%p1870_p8), %s2158_s3, %s1541_s19  ;;  %s295_s24 = scalar_lea.vmem (%p1870_p8), [#allocation8], %s1499_s20 }
  0x27   : > { %v1502_v2 = vld [vmem:[%s1366_s23 + $0x4] sm:$0xf] (%p1870_p8)  ;;  %v1503_v3 = vld [vmem:[%s1366_s23 + $0x14] sm:$0xf] (%p1870_p8) }
  0x28   : > { %319 = vst [vmem:[%s295_s24] sm:$0xf] (%p1870_p8), %v1502_v2  ;;  %321 = vst [vmem:[%s295_s24 + $0x4] sm:$0xf] (%p1870_p8), %v1503_v3 }
  0x2b PF: > { %348 = sbr.rel (!%p1870_p8) target bundleno = 50 (0x32), region = 106  ;;  %s350_s25 = sand.u32 (%p1870_p8), 1, %s1771_s27  }
  0x2c   : > { %s1542_s8 = sshll.u32 (%p1870_p8), %s1779_s0, 5  ;;  %s1504_s9 = sshll.u32 (%p1870_p8), %s350_s25, 3 }
  0x2d   : > { %s1374_s13 = scalar_lea.vmem (%p1870_p8), %s2159_s4, %s1542_s8  ;;  %s352_s14 = scalar_lea.vmem (%p1870_p8), [#allocation9], %s1504_s9 }
  0x2e   : > { %v1507_v4 = vld [vmem:[%s1374_s13 + $0x8] sm:$0xf] (%p1870_p8)  ;;  %v1508_v5 = vld [vmem:[%s1374_s13 + $0x18] sm:$0xf] (%p1870_p8) }
  0x2f   : > { %376 = vst [vmem:[%s352_s14] sm:$0xf] (%p1870_p8), %v1507_v4  ;;  %378 = vst [vmem:[%s352_s14 + $0x4] sm:$0xf] (%p1870_p8), %v1508_v5 }
  0x32 PF: > { %405 = sbr.rel (!%p1870_p8) target bundleno = 57 (0x39), region = 147  ;;  %s407_s15 = sand.u32 (%p1870_p8), 1, %s1771_s27  }
  0x33   : > { %s1543_s16 = sshll.u32 (%p1870_p8), %s1779_s0, 5  ;;  %s1509_s17 = sshll.u32 (%p1870_p8), %s407_s15, 3 }
  0x34   : > { %s1382_s20 = scalar_lea.vmem (%p1870_p8), %s2160_s5, %s1543_s16  ;;  %s409_s21 = scalar_lea.vmem (%p1870_p8), [#allocation10], %s1509_s17 }
  0x35   : > { %v1512_v6 = vld [vmem:[%s1382_s20 + $0xc] sm:$0xf] (%p1870_p8)  ;;  %v1513_v7 = vld [vmem:[%s1382_s20 + $0x1c] sm:$0xf] (%p1870_p8) }
  0x36   : > { %433 = vst [vmem:[%s409_s21] sm:$0xf] (%p1870_p8), %v1512_v6  ;;  %435 = vst [vmem:[%s409_s21 + $0x4] sm:$0xf] (%p1870_p8), %v1513_v7 }
  0x39 PF: > { %p1514_p11 = scmp.ge.s32.totalorder %s1783_s29, 1  ;;  %p461_p12 = scmp.lt.s32.totalorder %s1783_s29, 3 }
  0x3b   : > { %p462_p13 = pnand %p1514_p11, %p461_p12 }
  0x3c   : > { %s468_s7 = sand.u32 (!%p462_p13), 1, %s1767_s26   ;;  %p538_p0 = scmp.lt.s32.totalorder (!%p462_p13), %s1775_s28, 1  ;;  %vm563_vm0 = vcmask (!%p462_p13), 31744   ;;  %v1786_v8 = vmov (!%p462_p13), -3.4028235e+38   ;;  %v1787_v9 = vmov (!%p462_p13), 0.0  }
  0x3d   : > { %465 = sbr.rel (%p462_p13) target bundleno = 1619 (0x653), region = 188  ;;  %s1913_s22 = sshll.u32 (!%p462_p13), %s468_s7, 3  ;;  %564 = vst.msk [vmem:[#allocation2] sm:$0xff] (!%p462_p13), %vm563_vm0, %v1786_v8  ;;  %565 = vst.msk [vmem:[#allocation2 + $0x8] sm:$0xff] (!%p462_p13), %vm563_vm0, %v1786_v8 }
  0x3e   : > { %s571_s23 = sld [smem:[#allocation6 + %s1775_s28]] (!%p462_p13)  ;;  %566 = vst.msk [vmem:[#allocation3] sm:$0xff] (!%p462_p13), %vm563_vm0, %v1787_v9  ;;  %567 = vst.msk [vmem:[#allocation3 + $0x8] sm:$0xff] (!%p462_p13), %vm563_vm0, %v1787_v9  ;;  %s470_s13 = scalar_lea.vmem (!%p462_p13), [#allocation7], %s1913_s22 }
  0x3f   : > { %568 = vst [vmem:[#allocation4] sm:$0xff] (!%p462_p13), %v1787_v9  ;;  %569 = vst [vmem:[#allocation4 + $0x8] sm:$0xff] (!%p462_p13), %v1787_v9  ;;  %s477_s14 = scalar_lea.vmem (!%p462_p13), [#allocation8], %s1913_s22  ;;  %s484_s15 = scalar_lea.vmem (!%p462_p13), [#allocation9], %s1913_s22 }
  0x40   : > { %s491_s16 = scalar_lea.vmem (!%p462_p13), [#allocation10], %s1913_s22 }
  0x44   : > { %s2170_s28 = smov (!%p538_p0, %s1775_s28), 1  ;;  %p1522_p1 = scmp.le.s32.totalorder %s571_s23, 0 }
  0x45   : > { %s543_s25 = scalar_lea.vmem %s2156_s1, %s2170_s28  ;;  %s1544_s8 = sshll.u32 %s2170_s28, 3  ;;  %v1690_v10 = vld [vmem:[%s477_s14] sm:$0xff] (!%p1522_p1)   ;;  %v1788_v11 = vmov (!%p1522_p1), 0.0   ;;  %vm598_vm1 = vcmask (!%p1522_p1), 261120   ;;  %vm1789_vm2 = vmmov (!%p1522_p1), 0   ;;  %v1691_v13 = vld [vmem:[%s470_s13] sm:$0xff] (!%p1522_p1)   ;;  %v647_v15 = vlaneseq (!%p1522_p1) }
  0x46   : > { %s1927_s12 = scalar_lea.vmem %s2161_s6, %s1544_s8  ;;  %575 = sbr.rel (%p1522_p1) target bundleno = 1457 (0x5b1), region = 212  ;;  %1572 = vmatprep.subr.bf16.mxu0 (!%p1522_p1), %v1788_v11  ;;  %1578 = vmatprep.subr.bf16.mxu1 (!%p1522_p1), %v1788_v11  ;;  %v603_v12 = vsel (!%p1522_p1), %vm598_vm1, %v1690_v10, 0  ;;  %v1790_v14 = vmov (!%p1522_p1), 0   ;;  %v576_v16 = vld [vmem:[%s543_s25] sm:$0x1] (!%p1522_p1)  ;;  %vm654_vm5 = vcmask (!%p1522_p1), 130048  }
  0x47   : > { %1574 = vmatprep.mubr.msk.bf16.mxu0 (!%p1522_p1), %vm1789_vm2, %v1788_v11  ;;  %1580 = vmatprep.mubr.msk.bf16.mxu1 (!%p1522_p1), %vm1789_vm2, %v1788_v11  ;;  %v648_v17 = vshrl.u32 (!%p1522_p1), %v647_v15, 7  ;;  %vm577_vm3 = vcmp.ne.s32.totalorder (!%p1522_p1), %v576_v16, 0  ;;  %s1791_s28 = smov (!%p1522_p1), 96   ;;  %v1956_v29 = vld [vmem:[#allocation2] sm:$0xff] (!%p1522_p1)  ;;  %v1961_v32 = vld [vmem:[#allocation2 + $0x8] sm:$0xff] (!%p1522_p1)  ;;  %v1971_v35 = vld [vmem:[%s484_s15] sm:$0xff] (!%p1522_p1)  }
  0x48   : > { %1573 = vmatpush3.bf16.xpose.msra.mxu0 (!%p1522_p1), %v603_v12  ;;  %1676 = vset.pattern.permute.xlu1 (!%p1522_p1), %v1790_v14  ;;  %v646_v19 = vsel (!%p1522_p1), %vm577_vm3, 1, %v1790_v14  ;;  %s1792_s17 = smov (!%p1522_p1), 64   ;;  %s1793_s18 = smov (!%p1522_p1), 32   ;;  %vm1129_vm6 = vcmask (!%p1522_p1), 7168   ;;  %vm1132_vm7 = vcmask (!%p1522_p1), 15360   ;;  %vm1135_vm8 = vcmask (!%p1522_p1), 23552  }
  0x49   : > { %1590 = vmatprep.subr.bf16.mxu0 (!%p1522_p1), %v1788_v11  ;;  %v649_v18 = vsub.s32 (!%p1522_p1), 0, %v648_v17  ;;  %1579 = vmatpush3.bf16.msra.mxu1 (!%p1522_p1), %v1971_v35  ;;  %v1794_v17 = vmov (!%p1522_p1), 1   ;;  %vm1195_vm9 = vcmask (!%p1522_p1), 523264   ;;  %vm1198_vm10 = vcmask (!%p1522_p1), 785408  }
  0x4a   : > { %1584 = vmatprep.subr.bf16.mxu1 (!%p1522_p1), %v1788_v11  ;;  %1677 = vset.pattern.permute.xlu0 (!%p1522_p1), %v1794_v17 }
  0x4b   : > { %v1946_v20 = vrot.slane (!%p1522_p1), %v646_v19, %v649_v18 }
  0x4d   : > { %vm651_vm4 = vcmp.eq.s32.totalorder %v1946_v20, 1 }
  0x4f   : > { %1575 = vmatmul.mubr.msk.bf16.vlgmr.msra.gmra.mrb[0].mxu0 %vm598_vm1, %v1691_v13 }
  0x50   : > { %1592 = vmatprep.mubr.msk.bf16.mxu0 %vm1789_vm2, %v1788_v11 }
 0x122   : > { %v639_v21 = vpop.f32.mrb[0].mxu0 }
 0x123   : > { %v652_v22 = vsel %vm651_vm4, %v639_v21, -3.4028235e+38  ;;  %v1576_v23 = vpop.f32.mrb[1].mxu0 }
 0x124   : > { %v642_v24 = vpop.f32.mrb[2].mxu0  ;;  %v655_v25 = vsel %vm654_vm5, %v652_v22, -inf }
 0x125   : > { %v653_v26 = vsel %vm651_vm4, %v642_v24, -3.4028235e+38  ;;  %v1577_v27 = vpop.f32.mrb[3].mxu0  ;;  %656 = vmax.xlane.f32.xlu0 %v655_v25 }
 0x126   : > { %v658_v28 = vsel %vm654_vm5, %v653_v26, -inf  ;;  %v1795_v27 = vmov 2  }
 0x129   : > { %659 = vmax.xlane.f32.xlu0 %v658_v28 }
 0x13f   : > { %738 = vrot.lane.b32.xlu0 %v1690_v10, %s1791_s28 }
 0x1b2   : > { %v657_v30 = vpop.xlane.xlu0 %656 }
 0x1b3   : > { %v1959_v31 = vmax.f32 %v1956_v29, %v657_v30 }
 0x1b5   : > { %665 = vperm.xlu1 %1676, %v1959_v31  }
 0x1b6   : > { %v660_v33 = vpop.xlane.xlu0 %659 }
 0x1b7   : > { %v1965_v34 = vmax.f32 %v1961_v32, %v660_v33 }
 0x1b9   : > { %670 = vperm.xlu1 %1676, %v1965_v34  }
 0x1ba   : > { %v739_v43 = vpop.permute.xlu0 %738 }
 0x1bb   : > { %v744_v46 = vsel %vm598_vm1, %v739_v43, 0  ;;  %v1796_v43 = vmov 3  }
 0x1bd   : > { %736 = vrot.lane.b32.xlu1 %v1691_v13, %s1791_s28 }
 0x1be   : > { %1678 = vset.pattern.permute.xlu1 %v1794_v17 }
 0x1c1   : > { %869 = vrot.lane.b32.xlu1 %v1690_v10, %s1792_s17 }
 0x1c5   : > { %867 = vrot.lane.b32.xlu1 %v1691_v13, %s1792_s17 }
 0x1c9   : > { %1000 = vrot.lane.b32.xlu1 %v1690_v10, %s1793_s18 }
 0x1cd   : > { %998 = vrot.lane.b32.xlu1 %v1691_v13, %s1793_s18 }
 0x234   : > { %v666_v36 = vpop.permute.xlu1 %665 }
 0x235   : > { %v673_v37 = vsub.f32 %v652_v22, %v666_v36 }
 0x237   : > { %v675_v38 = vmul.f32 1.442695, %v673_v37 }
 0x238   : > { %v671_v39 = vpop.permute.xlu1 %670 }
 0x239   : > { %v674_v40 = vsub.f32 %v653_v26, %v671_v39  ;;  %1693 = vpow2.f32 %v675_v38 }
 0x23b   : > { %v677_v41 = vmul.f32 1.442695, %v674_v40 }
 0x23c   : > { %v737_v42 = vpop.permute.xlu1 %736 }
 0x23d   : > { %1695 = vpow2.f32 %v677_v41 }
 0x240   : > { %v870_v48 = vpop.permute.xlu1 %869 }
 0x241   : > { %v875_v50 = vsel %vm598_vm1, %v870_v48, 0 }
 0x243   : > { %v1979_v44 = vpop.eup %1693 }
 0x244   : > { %v868_v49 = vpop.permute.xlu1 %867 }
 0x247   : > { %v1981_v45 = vpop.eup %1695 }
 0x248   : > { %v685_v47 = vpack.c.bf16 %v1981_v45, %v1979_v44  ;;  %v1001_v51 = vpop.permute.xlu1 %1000 }
 0x249   : > { %v1006_v52 = vsel %vm598_vm1, %v1001_v51, 0 }
 0x24a   : > { %1581 = vmatmul.mubr.msk.bf16.vlgmr.msra.gmra.mrb[0].mxu1 %vm654_vm5, %v685_v47 }
 0x24b   : > { %1585 = vmatpush3.bf16.xpose.msra.mxu1 %v744_v46  ;;  %1586 = vmatprep.mubr.msk.bf16.mxu1 %vm1789_vm2, %v1788_v11 }
 0x24c   : > { %1596 = vmatprep.subr.bf16.mxu1 %v1788_v11  ;;  %v999_v53 = vpop.permute.xlu1 %998 }
 0x252   : > { %1587 = vmatmul.mubr.msk.bf16.vlgmr.msra.gmra.mrb[4].mxu1 %vm598_vm1, %v737_v42 }
 0x253   : > { %1597 = vmatpush3.bf16.xpose.msra.mxu1 %v875_v50  ;;  %1598 = vmatprep.mubr.msk.bf16.mxu1 %vm1789_vm2, %v1788_v11  ;;  %v679_v50 = vsel %vm654_vm5, %v1979_v44, 0.0 }
 0x254   : > { %1608 = vmatprep.subr.bf16.mxu1 %v1788_v11 }
 0x25a   : > { %1599 = vmatmul.mubr.msk.bf16.vlgmr.msra.gmra.mrb[8].mxu1 %vm598_vm1, %v868_v49 }
 0x25b   : > { %1609 = vmatpush3.bf16.xpose.msra.mxu1 %v1006_v52  ;;  %1610 = vmatprep.mubr.msk.bf16.mxu1 %vm1789_vm2, %v1788_v11 }
 0x262   : > { %1611 = vmatmul.mubr.msk.bf16.vlgmr.msra.gmra.mrb[12].mxu1 %vm598_vm1, %v999_v53 }
 0x31d   : > { %v2000_v54 = vpop.f32.mrb[0].mxu1 }
 0x31e   : > { %v1582_v55 = vpop.f32.mrb[1].mxu1 }
 0x31f   : > { %v2002_v56 = vpop.f32.mrb[2].mxu1 }
 0x320   : > { %v1583_v57 = vpop.f32.mrb[3].mxu1 }
 0x325   : > { %v780_v58 = vpop.f32.mrb[4].mxu1 }
 0x326   : > { %v2006_v59 = vsel %vm651_vm4, %v780_v58, -3.4028235e+38  ;;  %v1588_v60 = vpop.f32.mrb[5].mxu1 }
 0x327   : > { %v783_v61 = vpop.f32.mrb[6].mxu1  ;;  %v789_v62 = vsel %vm654_vm5, %v2006_v59, -inf }
 0x328   : > { %v2012_v63 = vsel %vm651_vm4, %v783_v61, -3.4028235e+38  ;;  %790 = vmax.xlane.f32.xlu1 %v789_v62  ;;  %v1589_v0 = vpop.f32.mrb[7].mxu1 }
 0x329   : > { %v792_v1 = vsel %vm654_vm5, %v2012_v63, -inf }
 0x32a   : > { %793 = vmax.xlane.f32.xlu0 %v792_v1 }
 0x32d   : > { %v911_v2 = vpop.f32.mrb[8].mxu1 }
 0x32e   : > { %v2018_v3 = vsel %vm651_vm4, %v911_v2, -3.4028235e+38  ;;  %v1600_v4 = vpop.f32.mrb[9].mxu1 }
 0x32f   : > { %v914_v5 = vpop.f32.mrb[10].mxu1  ;;  %v920_v6 = vsel %vm654_vm5, %v2018_v3, -inf }
 0x330   : > { %v2024_v7 = vsel %vm651_vm4, %v914_v5, -3.4028235e+38  ;;  %921 = vmax.xlane.f32.xlu0 %v920_v6  ;;  %v1601_v8 = vpop.f32.mrb[11].mxu1 }
 0x331   : > { %v923_v9 = vsel %vm654_vm5, %v2024_v7, -inf }
 0x332   : > { %924 = vmax.xlane.f32.xlu1 %v923_v9 }
 0x335   : > { %v1042_v10 = vpop.f32.mrb[12].mxu1 }
 0x336   : > { %v2030_v12 = vsel %vm651_vm4, %v1042_v10, -3.4028235e+38  ;;  %v1612_v13 = vpop.f32.mrb[13].mxu1 }
 0x337   : > { %v1045_v15 = vpop.f32.mrb[14].mxu1  ;;  %v1051_v16 = vsel %vm654_vm5, %v2030_v12, -inf }
 0x338   : > { %v2038_v18 = vsel %vm651_vm4, %v1045_v15, -3.4028235e+38  ;;  %1052 = vmax.xlane.f32.xlu0 %v1051_v16  ;;  %v1613_v19 = vpop.f32.mrb[15].mxu1 }
 0x339   : > { %v1054_v21 = vsel %vm654_vm5, %v2038_v18, -inf }
 0x33a   : > { %1055 = vmax.xlane.f32.xlu1 %v1054_v21 }
 0x3b5   : > { %v791_v22 = vpop.xlane.xlu1 %790 }
 0x3b6   : > { %v795_v23 = vmax.f32 %v1956_v29, %v791_v22 }
 0x3b7   : > { %v794_v24 = vpop.xlane.xlu0 %793 }
 0x3b8   : > { %v796_v25 = vmax.f32 %v1961_v32, %v794_v24  ;;  %799 = vperm.xlu0 %1677, %v795_v23   ;;  %v1130_v36 = vsel %vm1129_vm6, %v1959_v31, %v795_v23 }
 0x3ba   : > { %804 = vperm.xlu1 %1678, %v796_v25   ;;  %v1131_v40 = vsel %vm1129_vm6, %v1965_v34, %v796_v25  ;;  %v682_v34 = vsel %vm654_vm5, %v1981_v45, 0.0 }
 0x3bc   : > { %1082 = vrot.lane.b32.xlu0 %v1971_v35, %s1793_s18 }
 0x3bd   : > { %v922_v20 = vpop.xlane.xlu0 %921  ;;  %1681 = vset.pattern.permute.xlu0 %v1790_v14 }
 0x3be   : > { %v926_v26 = vmax.f32 %v1956_v29, %v922_v20  ;;  %1679 = vset.pattern.permute.xlu1 %v1795_v27 }
 0x3bf   : > { %v925_v28 = vpop.xlane.xlu1 %924 }
 0x3c0   : > { %930 = vperm.xlu1 %1679, %v926_v26   ;;  %v927_v30 = vmax.f32 %v1961_v32, %v925_v28  ;;  %v1133_v38 = vsel %vm1132_vm7, %v1130_v36, %v926_v26 }
 0x3c2   : > { %v1134_v46 = vsel %vm1132_vm7, %v1131_v40, %v927_v30 }
 0x3c4   : > { %935 = vperm.xlu1 %1679, %v927_v30  }
 0x3c5   : > { %v1053_v33 = vpop.xlane.xlu0 %1052 }
 0x3c6   : > { %v1057_v37 = vmax.f32 %v1956_v29, %v1053_v33 }
 0x3c7   : > { %v1056_v39 = vpop.xlane.xlu1 %1055 }
 0x3c8   : > { %v1136_v41 = vsel %vm1135_vm8, %v1133_v38, %v1057_v37  ;;  %v1058_v42 = vmax.f32 %v1961_v32, %v1056_v39  ;;  %1680 = vset.pattern.permute.xlu1 %v1796_v43 }
 0x3c9   : > { %1145 = vst.msk [vmem:[#allocation2] sm:$0xff] %vm563_vm0, %v1136_v41  ;;  %1061 = vperm.xlu1 %1680, %v1057_v37   ;;  %v1138_v47 = vsub.f32 %v1956_v29, %v1136_v41 }
 0x3ca   : > { %v1137_v31 = vsel %vm1135_vm8, %v1134_v46, %v1058_v42 }
 0x3cb   : > { %1146 = vst.msk [vmem:[#allocation2 + $0x8] sm:$0xff] %vm563_vm0, %v1137_v31  ;;  %v1140_v48 = vmul.f32 1.442695, %v1138_v47  ;;  %v1139_v51 = vsub.f32 %v1961_v32, %v1137_v31  ;;  %v580_v47 = vld [vmem:[#allocation3] sm:$0xff] }
 0x3cd   : > { %1066 = vperm.xlu1 %1680, %v1058_v42   ;;  %1697 = vpow2.f32 %v1140_v48 }
 0x3d1   : > { %820 = vrot.lane.b32.xlu1 %v1971_v35, %s1791_s28 }
 0x3d2   : > { %1682 = vset.pattern.permute.xlu1 %v1794_v17 }
 0x3d5   : > { %951 = vrot.lane.b32.xlu1 %v1971_v35, %s1792_s17  ;;  %v1142_v35 = vmul.f32 1.442695, %v1139_v51 }
 0x3d7   : > { %v2069_v49 = vpop.eup %1697  ;;  %1699 = vpow2.f32 %v1142_v35 }
 0x3d8   : > { %v1147_v35 = vmul.f32 %v2069_v49, %v580_v47 }
 0x3db   : > { %683 = vadd.xlane.f32.xlu0 %v682_v34 }
 0x3e1   : > { %v2078_v29 = vpop.eup %1699 }
 0x3f1   : > { %1161 = vperm.xlu0 %1681, %v2069_v49  }
 0x3f5   : > { %1689 = vset.pattern.permute.xlu0 %v1796_v43 }
 0x3f9   : > { %680 = vadd.xlane.f32.xlu1 %v679_v50 }
 0x40a   : > { %1170 = vperm.xlu1 %1682, %v2069_v49  }
 0x40e   : > { %1683 = vset.pattern.permute.xlu1 %v1795_v27 }
 0x40f   : > { %1178 = vperm.xlu1 %1683, %v2069_v49  }
 0x413   : > { %1684 = vset.pattern.permute.xlu1 %v1796_v43 }
 0x414   : > { %1186 = vperm.xlu1 %1684, %v2069_v49  }
 0x418   : > { %1685 = vset.pattern.permute.xlu1 %v1790_v14 }
 0x419   : > { %1166 = vperm.xlu1 %1685, %v2078_v29  }
 0x41d   : > { %1686 = vset.pattern.permute.xlu1 %v1794_v17 }
 0x41e   : > { %1174 = vperm.xlu1 %1686, %v2078_v29  }
 0x422   : > { %1687 = vset.pattern.permute.xlu1 %v1795_v27 }
 0x423   : > { %1182 = vperm.xlu1 %1687, %v2078_v29  }
 0x427   : > { %1688 = vset.pattern.permute.xlu1 %v1796_v43 }
 0x428   : > { %1190 = vperm.xlu1 %1688, %v2078_v29  }
 0x437   : > { %v800_v32 = vpop.permute.xlu0 %799 }
 0x438   : > { %v807_v44 = vsub.f32 %v2006_v59, %v800_v32 }
 0x439   : > { %v805_v45 = vpop.permute.xlu1 %804 }
 0x43a   : > { %v809_v52 = vmul.f32 1.442695, %v807_v44  ;;  %v808_v53 = vsub.f32 %v2012_v63, %v805_v45  ;;  %v581_v45 = vld [vmem:[#allocation3 + $0x8] sm:$0xff] }
 0x43b   : > { %v1083_v21 = vpop.permute.xlu0 %1082 }
 0x43c   : > { %1701 = vpow2.f32 %v809_v52  ;;  %v811_v14 = vmul.f32 1.442695, %v808_v53 }
 0x43e   : > { %1703 = vpow2.f32 %v811_v14 }
 0x43f   : > { %v931_v55 = vpop.permute.xlu1 %930 }
 0x440   : > { %v938_v57 = vsub.f32 %v2018_v3, %v931_v55  ;;  %v1148_v55 = vmul.f32 %v2078_v29, %v581_v45 }
 0x442   : > { %v940_v58 = vmul.f32 1.442695, %v938_v57 }
 0x443   : > { %v936_v60 = vpop.permute.xlu1 %935 }
 0x444   : > { %1705 = vpow2.f32 %v940_v58  ;;  %v939_v61 = vsub.f32 %v2024_v7, %v936_v60 }
 0x446   : > { %v1702_v62 = vpop.eup %1701  ;;  %v942_v0 = vmul.f32 1.442695, %v939_v61 }
 0x447   : > { %v813_v1 = vsel %vm654_vm5, %v1702_v62, 0.0 }
 0x448   : > { %v1704_v59 = vpop.eup %1703  ;;  %1707 = vpow2.f32 %v942_v0  ;;  %814 = vadd.xlane.f32.xlu0 %v813_v1  ;;  %v1062_v2 = vpop.permute.xlu1 %1061 }
 0x449   : > { %v1069_v63 = vsub.f32 %v2030_v12, %v1062_v2  ;;  %v816_v5 = vsel %vm654_vm5, %v1704_v59, 0.0  ;;  %v819_v15 = vpack.c.bf16 %v1704_v59, %v1702_v62 }
 0x44b   : > { %v1071_v4 = vmul.f32 1.442695, %v1069_v63 }
 0x44c   : > { %817 = vadd.xlane.f32.xlu1 %v816_v5  ;;  %v1067_v3 = vpop.permute.xlu1 %1066 }
 0x44d   : > { %1709 = vpow2.f32 %v1071_v4  ;;  %v1070_v6 = vsub.f32 %v2038_v18, %v1067_v3 }
 0x44e   : > { %v1706_v8 = vpop.eup %1705 }
 0x44f   : > { %v1073_v7 = vmul.f32 1.442695, %v1070_v6  ;;  %v944_v9 = vsel %vm654_vm5, %v1706_v8, 0.0 }
 0x450   : > { %945 = vadd.xlane.f32.xlu0 %v944_v9  ;;  %v821_v10 = vpop.permute.xlu1 %820  ;;  %v1201_v9 = vld [vmem:[#allocation4] sm:$0xff] }
 0x451   : > { %1711 = vpow2.f32 %v1073_v7  ;;  %1591 = vmatpush3.bf16.msra.mxu0 %v821_v10 }
 0x452   : > { %v1708_v13 = vpop.eup %1707  ;;  %1602 = vmatprep.subr.bf16.mxu0 %v1788_v11 }
 0x453   : > { %v947_v12 = vsel %vm654_vm5, %v1708_v13, 0.0  ;;  %v950_v19 = vpack.c.bf16 %v1708_v13, %v1706_v8  ;;  %v1202_v13 = vld [vmem:[#allocation4 + $0x8] sm:$0xff] }
 0x454   : > { %948 = vadd.xlane.f32.xlu1 %v947_v12  ;;  %1593 = vmatmul.mubr.msk.bf16.vlgmr.msra.gmra.mrb[4].mxu0 %vm654_vm5, %v819_v15  ;;  %v952_v16 = vpop.permute.xlu1 %951 }
 0x455   : > { %1603 = vmatpush3.bf16.msra.mxu0 %v952_v16  ;;  %1604 = vmatprep.mubr.msk.bf16.mxu0 %vm1789_vm2, %v1788_v11 }
 0x456   : > { %1614 = vmatprep.subr.bf16.mxu0 %v1788_v11 }
 0x457   : > { %v1710_v17 = vpop.eup %1709 }
 0x458   : > { %v1075_v18 = vsel %vm654_vm5, %v1710_v17, 0.0 }
 0x459   : > { %1076 = vadd.xlane.f32.xlu0 %v1075_v18 }
 0x45b   : > { %v1712_v22 = vpop.eup %1711 }
 0x45c   : > { %1605 = vmatmul.mubr.msk.bf16.vlgmr.msra.gmra.mrb[8].mxu0 %vm654_vm5, %v950_v19  ;;  %v1078_v23 = vsel %vm654_vm5, %v1712_v22, 0.0  ;;  %v1081_v24 = vpack.c.bf16 %v1712_v22, %v1710_v17 }
 0x45d   : > { %1079 = vadd.xlane.f32.xlu1 %v1078_v23  ;;  %1615 = vmatpush3.bf16.msra.mxu0 %v1083_v21 }
 0x45e   : > { %1616 = vmatprep.mubr.msk.bf16.mxu0 %vm1789_vm2, %v1788_v11 }
 0x464   : > { %1617 = vmatmul.mubr.msk.bf16.vlgmr.msra.gmra.mrb[12].mxu0 %vm654_vm5, %v1081_v24 }
 0x468   : > { %v684_v20 = vpop.xlane.xlu0 %683 }
 0x470   : > { %v1162_v27 = vpop.permute.xlu0 %1161 }
 0x486   : > { %v681_v25 = vpop.xlane.xlu1 %680 }
 0x48a   : > { %v1171_v26 = vpop.permute.xlu1 %1170 }
 0x48b   : > { %v1193_v28 = vsel %vm598_vm1, %v1162_v27, %v1171_v26 }
 0x48e   : > { %v1179_v30 = vpop.permute.xlu1 %1178 }
 0x48f   : > { %v1196_v33 = vsel %vm1195_vm9, %v1193_v28, %v1179_v30 }
 0x493   : > { %v1187_v36 = vpop.permute.xlu1 %1186 }
 0x494   : > { %v1199_v37 = vsel %vm1198_vm10, %v1196_v33, %v1187_v36 }
 0x495   : > { %v1203_v12 = vmul.f32 %v1201_v9, %v1199_v37 }
 0x498   : > { %v1167_v38 = vpop.permute.xlu1 %1166 }
 0x49d   : > { %v1175_v39 = vpop.permute.xlu1 %1174 }
 0x49e   : > { %v1194_v11 = vsel %vm598_vm1, %v1167_v38, %v1175_v39 }
 0x4a2   : > { %v1183_v40 = vpop.permute.xlu1 %1182 }
 0x4a3   : > { %v1197_v41 = vsel %vm1195_vm9, %v1194_v11, %v1183_v40 }
 0x4a7   : > { %v1191_v42 = vpop.permute.xlu1 %1190 }
 0x4a8   : > { %v1200_v43 = vsel %vm1198_vm10, %v1197_v41, %v1191_v42 }
 0x4a9   : > { %v1204_v21 = vmul.f32 %v1202_v13, %v1200_v43 }
 0x4d5   : > { %v815_v46 = vpop.xlane.xlu0 %814 }
 0x4d6   : > { %v1149_v48 = vsel %vm1129_vm6, %v681_v25, %v815_v46 }
 0x4d9   : > { %v818_v31 = vpop.xlane.xlu1 %817 }
 0x4da   : > { %v1150_v53 = vsel %vm1129_vm6, %v684_v20, %v818_v31 }
 0x4dd   : > { %v946_v34 = vpop.xlane.xlu0 %945 }
 0x4de   : > { %v1151_v50 = vsel %vm1132_vm7, %v1149_v48, %v946_v34 }
 0x4e1   : > { %v949_v51 = vpop.xlane.xlu1 %948 }
 0x4e2   : > { %v1152_v14 = vsel %vm1132_vm7, %v1150_v53, %v949_v51 }
 0x4e6   : > { %v1077_v32 = vpop.xlane.xlu0 %1076 }
 0x4e7   : > { %v1153_v44 = vsel %vm1135_vm8, %v1151_v50, %v1077_v32 }
 0x4e8   : > { %v1155_v52 = vadd.f32 %v1153_v44, %v1147_v35 }
 0x4ea   : > { %1157 = vst.msk [vmem:[#allocation3] sm:$0xff] %vm563_vm0, %v1155_v52  ;;  %v1080_v57 = vpop.xlane.xlu1 %1079 }
 0x4eb   : > { %v1154_v58 = vsel %vm1135_vm8, %v1152_v14, %v1080_v57 }
 0x4ec   : > { %v1156_v60 = vadd.f32 %v1154_v58, %v1148_v55 }
 0x4ee   : > { %1158 = vst.msk [vmem:[#allocation3 + $0x8] sm:$0xff] %vm563_vm0, %v1156_v60 }
 0x527   : > { %v860_v49 = vpop.f32.mrb[4].mxu0 }
 0x528   : > { %1207 = vrot.lane.b32.xlu1 %v860_v49, %s1793_s18  ;;  %v1594_v61 = vpop.f32.mrb[5].mxu0 }
 0x529   : > { %v863_v62 = vpop.f32.mrb[6].mxu0 }
 0x52a   : > { %1209 = vrot.lane.b32.xlu0 %v863_v62, %s1793_s18  ;;  %v1595_v0 = vpop.f32.mrb[7].mxu0 }
 0x52f   : > { %v991_v1 = vpop.f32.mrb[8].mxu0 }
 0x530   : > { %1215 = vrot.lane.b32.xlu1 %v991_v1, %s1792_s17  ;;  %v1606_v59 = vpop.f32.mrb[9].mxu0 }
 0x531   : > { %v994_v2 = vpop.f32.mrb[10].mxu0 }
 0x532   : > { %1217 = vrot.lane.b32.xlu0 %v994_v2, %s1792_s17  ;;  %v1607_v29 = vpop.f32.mrb[11].mxu0 }
 0x537   : > { %v1122_v63 = vpop.f32.mrb[12].mxu0 }
 0x538   : > { %1223 = vrot.lane.b32.xlu1 %v1122_v63, %s1791_s28  ;;  %v1618_v4 = vpop.f32.mrb[13].mxu0 }
 0x539   : > { %v1125_v5 = vpop.f32.mrb[14].mxu0 }
 0x53a   : > { %1225 = vrot.lane.b32.xlu0 %v1125_v5, %s1791_s28  ;;  %v1619_v3 = vpop.f32.mrb[15].mxu0 }
 0x59a   : > { %v1208_v6 = vpop.permute.xlu1 %1207 }
 0x59b   : > { %v1229_v15 = vsel %vm598_vm1, %v2000_v54, %v1208_v6 }
 0x59c   : > { %v1210_v8 = vpop.permute.xlu0 %1209 }
 0x59d   : > { %v1230_v18 = vsel %vm598_vm1, %v2002_v56, %v1210_v8 }
 0x5a2   : > { %v1216_v7 = vpop.permute.xlu1 %1215 }
 0x5a3   : > { %v1231_v16 = vsel %vm1195_vm9, %v1229_v15, %v1216_v7 }
 0x5a4   : > { %v1218_v10 = vpop.permute.xlu0 %1217 }
 0x5a5   : > { %v1232_v22 = vsel %vm1195_vm9, %v1230_v18, %v1218_v10 }
 0x5aa   : > { %v1224_v17 = vpop.permute.xlu1 %1223 }
 0x5ab   : > { %v1233_v19 = vsel %vm1198_vm10, %v1231_v16, %v1224_v17 }
 0x5ac   : > { %v1235_v23 = vadd.f32 %v1233_v19, %v1203_v12  ;;  %v1226_v24 = vpop.permute.xlu0 %1225 }
 0x5ad   : > { %v1234_v25 = vsel %vm1198_vm10, %v1232_v22, %v1226_v24 }
 0x5ae   : > { %1237 = vst [vmem:[#allocation4] sm:$0xff] %v1235_v23  ;;  %v1236_v20 = vadd.f32 %v1234_v25, %v1204_v21 }
 0x5b0   : > { %1238 = vst [vmem:[#allocation4 + $0x8] sm:$0xff] %v1236_v20 }
 0x5b1 PF: > { %v1242_v54 = vld [vmem:[#allocation3] sm:$0xff]  ;;  %v1243_v26 = vld [vmem:[#allocation3 + $0x8] sm:$0xff]  ;;  %v1797_v27 = vmov 1   ;;  %v1798_v28 = vmov 0   ;;  %v1799_v33 = vmov 2   ;;  %v1800_v36 = vmov 3  }
 0x5b2   : > { %1714 = vset.pattern.permute.xlu1 %v1797_v27  ;;  %1713 = vset.pattern.permute.xlu0 %v1798_v28  ;;  %1719 = vrcp.f32 %v1242_v54  ;;  %v1548_v37 = vld [vmem:[%s491_s16] sm:$0xff]   ;;  %vm1280_vm11 = vcmask 261120   ;;  %vm1283_vm12 = vcmask 523264   ;;  %vm1286_vm13 = vcmask 785408  }
 0x5b3   : > { %1721 = vrcp.f32 %v1243_v26  ;;  %v1549_v38 = vunpack.c.l.bf16 %v1548_v37  ;;  %v1550_v39 = vunpack.c.h.bf16 %v1548_v37 }
 0x5b5   : > { %v1534_v11 = vmul.f32 -1.442695, %v1549_v38  ;;  %v1535_v40 = vmul.f32 -1.442695, %v1550_v39  ;;  %v1305_v44 = vld [vmem:[#allocation4] sm:$0xff] }
 0x5b7   : > { %1723 = vpow2.f32 %v1534_v11  ;;  %v1306_v45 = vld [vmem:[#allocation4 + $0x8] sm:$0xff] }
 0x5b8   : > { %1725 = vpow2.f32 %v1535_v40 }
 0x5bc   : > { %v1720_v56 = vpop.eup %1719 }
 0x5bd   : > { %1257 = vperm.xlu1 %1714, %v1720_v56   ;;  %1248 = vperm.xlu0 %1713, %v1720_v56   ;;  %v1722_v30 = vpop.eup %1721 }
 0x5c1   : > { %1261 = vperm.xlu1 %1714, %v1722_v30   ;;  %1253 = vperm.xlu0 %1713, %v1722_v30   ;;  %v1724_v41 = vpop.eup %1723 }
 0x5c2   : > { %v1726_v42 = vpop.eup %1725  ;;  %v1299_v31 = vadd.f32 1.0, %v1724_v41 }
 0x5c3   : > { %v1300_v34 = vadd.f32 1.0, %v1726_v42 }
 0x5c4   : > { %1727 = vrcp.f32 %v1299_v31 }
 0x5c5   : > { %1716 = vset.pattern.permute.xlu1 %v1799_v33  ;;  %1715 = vset.pattern.permute.xlu0 %v1799_v33  ;;  %1729 = vrcp.f32 %v1300_v34 }
 0x5c6   : > { %1269 = vperm.xlu1 %1716, %v1722_v30   ;;  %1265 = vperm.xlu0 %1715, %v1720_v56  }
 0x5ca   : > { %1717 = vset.pattern.permute.xlu1 %v1800_v36  ;;  %1718 = vset.pattern.permute.xlu0 %v1800_v36 }
 0x5cb   : > { %1273 = vperm.xlu1 %1717, %v1720_v56   ;;  %1277 = vperm.xlu0 %1718, %v1722_v30  }
 0x5ce   : > { %v1728_v52 = vpop.eup %1727 }
 0x5cf   : > { %v1730_v58 = vpop.eup %1729 }
 0x63c   : > { %v1258_v43 = vpop.permute.xlu1 %1257  ;;  %v1249_v46 = vpop.permute.xlu0 %1248 }
 0x63d   : > { %v1281_v35 = vsel %vm1280_vm11, %v1249_v46, %v1258_v43 }
 0x640   : > { %v1262_v47 = vpop.permute.xlu1 %1261  ;;  %v1254_v48 = vpop.permute.xlu0 %1253 }
 0x641   : > { %v1282_v32 = vsel %vm1280_vm11, %v1254_v48, %v1262_v47 }
 0x645   : > { %v1270_v50 = vpop.permute.xlu1 %1269  ;;  %v1266_v51 = vpop.permute.xlu0 %1265 }
 0x646   : > { %v1285_v53 = vsel %vm1283_vm12, %v1282_v32, %v1270_v50  ;;  %v1284_v14 = vsel %vm1283_vm12, %v1281_v35, %v1266_v51 }
 0x64a   : > { %v1274_v55 = vpop.permute.xlu1 %1273  ;;  %v1278_v57 = vpop.permute.xlu0 %1277 }
 0x64b   : > { %v1287_v60 = vsel %vm1286_vm13, %v1284_v14, %v1274_v55  ;;  %v1288_v49 = vsel %vm1286_vm13, %v1285_v53, %v1278_v57 }
 0x64c   : > { %v1307_v61 = vmul.f32 %v1305_v44, %v1287_v60  ;;  %v1308_v62 = vmul.f32 %v1306_v45, %v1288_v49 }
 0x64e   : > { %v1309_v0 = vmul.f32 %v1728_v52, %v1307_v61  ;;  %v1310_v1 = vmul.f32 %v1730_v58, %v1308_v62 }
 0x650   : > { %v1554_v59 = vpack.c.bf16 %v1310_v1, %v1309_v0 }
 0x652   : > { %1555 = vst [vmem:[%s1927_s12] sm:$0xff] %v1554_v59  }
 0x653 PF: > { %s22_s29 = sadd.s32 1, %s1783_s29   ;;  %s2163_s26 = smov %s1771_s27 }
 0x654   : > { %p19_p2 = scmp.ge.s32.totalorder %s22_s29, 4   ;;  %s2164_s27 = smov %s1878_s10 }
 0x655   : > { %s2165_s28 = smov %s1779_s0  ;;  %s2166_s0 = smov %s2168_s30 }
 0x656   :  { %21 = sbr.rel (!%p19_p2) target bundleno = 18 (0x12), region = 278 }

</bundles_post_ra>
